<compile_context>
chip_gen: v7x
topology: tpu7x:2x2x1
jax: 0.10.0
libtpu: 0.0.40
codegen_flags: <defaults>
</compile_context>

<pallas_src>
import math

import jax
import jax.numpy as jnp
from jax import lax
from jax.experimental import pallas as pl
from jax.experimental.pallas import tpu as pltpu

HIDDEN = 64      # RNNEncoder hidden_size
IN_SIZE = 35     # RNNEncoder in_size (MOSEI visual feature dim)
OUT_SIZE = 64    # RNNEncoder out_size
NUM_LAYERS = 4   # stacked BiLSTM depth (only layer 0 reaches the output)


def _lstm_cls_kernel(x_ref, wih_ref, bih_ref, whh_ref,
                     w_feat_ref, b_feat_ref, w_pred_ref, b_pred_ref,
                     feat_ref, pred_ref):
    """Fused bidirectional LSTM (layer 0) recurrence + two dense heads in VMEM.

    x_ref     : (S*B, F)   time-major input flattened over (S, B)
    wih_ref   : (F, 8H)    [W_ih_fwd | W_ih_bwd]  (pre-transposed)
    bih_ref   : (1, 8H)    [b_fwd | b_bwd]        (b_ih + b_hh folded)
    whh_ref   : (2H, 4H)   [W_hh_fwd ; W_hh_bwd]  (pre-transposed, row-stacked)
    w_feat_ref: (2H, OUT)  lin1 weight (pre-transposed)
    w_pred_ref: (2H, C)    fused lin1 @ cls weight
    """
    H = HIDDEN
    B = feat_ref.shape[0]
    S = x_ref.shape[0] // B

    # Hoisted input-to-hidden projection for both directions: one MXU matmul,
    # bias folded in -> nothing input-dependent left on the serial chain.
    xg = jnp.dot(x_ref[...], wih_ref[...],
                 preferred_element_type=jnp.float32) + bih_ref[...]   # (S*B, 8H)

    whh = whh_ref[...]                                                # (2H, 4H)

    # Block mask selecting [hf | 0] for rows 0:B and [0 | hb] for rows B:2B,
    # so a single (2B,2H)@(2H,4H) dot computes both directions' recurrences.
    row = lax.broadcasted_iota(jnp.int32, (2 * B, 2 * H), 0)
    col = lax.broadcasted_iota(jnp.int32, (2 * B, 2 * H), 1)
    dir_mask = (((row < B) & (col < H)) |
                ((row >= B) & (col >= H))).astype(jnp.float32)

    h_stack = jnp.zeros((2 * B, 2 * H), jnp.float32)   # [hf | 0 ; 0 | hb]
    c_stack = jnp.zeros((2 * B, H), jnp.float32)       # [cf ; cb]
    h_raw = jnp.zeros((2 * B, H), jnp.float32)         # [hf ; hb]

    # Fully-unrolled recurrence (S static): state stays in vregs, one fused
    # MXU push + one EUP sigmoid slab + one tanh per step for both directions.
    for t in range(S):
        xg_f = xg[t * B:(t + 1) * B, :4 * H]             # fwd consumes x[t]
        xg_b = xg[(S - 1 - t) * B:(S - t) * B, 4 * H:]   # bwd consumes x[S-1-t]
        gates = (jnp.concatenate([xg_f, xg_b], axis=0)
                 + jnp.dot(h_stack, whh, preferred_element_type=jnp.float32))
        # PyTorch LSTM gate order: i, f, g, o
        sig = jax.nn.sigmoid(gates)                      # one EUP pass, whole slab
        i_g = sig[:, 0 * H:1 * H]
        f_g = sig[:, 1 * H:2 * H]
        o_g = sig[:, 3 * H:4 * H]
        g_g = jnp.tanh(gates[:, 2 * H:3 * H])
        c_stack = f_g * c_stack + i_g * g_g
        h_raw = o_g * jnp.tanh(c_stack)                  # (2B, H)
        h_stack = jnp.concatenate([h_raw, h_raw], axis=1) * dir_mask

    # TODO(synk): nn.Dropout(0.3) on h is inference-mode identity here.
    h_cat = jnp.concatenate([h_raw[:B], h_raw[B:]], axis=1)           # (B, 2H)
    # Two independent head matmuls (cls head pre-fused with lin1).
    feat = jnp.dot(h_cat, w_feat_ref[...],
                   preferred_element_type=jnp.float32) + b_feat_ref[...]
    pred = jnp.dot(h_cat, w_pred_ref[...],
                   preferred_element_type=jnp.float32) + b_pred_ref[...]
    feat_ref[...] = feat.astype(feat_ref.dtype)
    pred_ref[...] = pred.astype(pred_ref.dtype)


def mosei_v_cls_forward(params, x):
    """x is a tuple of modality tensors; only x[1] (video, (B,S,35)) is used."""
    feat_in = x[1]
    xs = jnp.transpose(feat_in, (1, 0, 2)).astype(jnp.float32)       # (S, B, F)
    S, B, F = xs.shape
    x2d = xs.reshape(S * B, F)
    num_classes = params['cls_b'].shape[1]

    pf, pb = params['l0_fwd'], params['l0_bwd']
    # One-time tiny XLA prep outside the kernel: concatenated / fused weights.
    wih_cat = jnp.concatenate([pf['wih_t'], pb['wih_t']], axis=1)    # (F, 8H)
    bih_cat = jnp.concatenate([pf['b'], pb['b']], axis=1)            # (1, 8H)
    whh_stack = jnp.concatenate([pf['whh_t'], pb['whh_t']], axis=0)  # (2H, 4H)
    # No nonlinearity between lin1 and cls -> fuse so pred reads h_cat directly.
    w_pred = jnp.dot(params['lin1_w'], params['cls_w'],
                     precision=lax.Precision.HIGHEST)                # (2H, C)
    b_pred = jnp.dot(params['lin1_b'], params['cls_w'],
                     precision=lax.Precision.HIGHEST) + params['cls_b']

    vmem = pl.BlockSpec(memory_space=pltpu.MemorySpace.VMEM)
    args = (x2d, wih_cat, bih_cat, whh_stack,
            params['lin1_w'], params['lin1_b'], w_pred, b_pred)

    feat, pred = pl.pallas_call(
        _lstm_cls_kernel,
        out_shape=(jax.ShapeDtypeStruct((B, OUT_SIZE), jnp.float32),
                   jax.ShapeDtypeStruct((B, num_classes), jnp.float32)),
        in_specs=[vmem] * len(args),
        out_specs=(vmem, vmem),
    )(*args)

    return {'preds': {'combined': pred}, 'features': {'combined': feat}}


def init_params(key, num_classes=7):
    """Deterministic synthetic parameters matching the module's shapes."""
    H = HIDDEN
    keys = iter(jax.random.split(key, 48))

    def unif(k, shape, bound):
        return jax.random.uniform(k, shape, jnp.float32, -bound, bound)

    k_lstm = 1.0 / math.sqrt(H)
    lstm_layers = []
    for layer in range(NUM_LAYERS):
        in_sz = IN_SIZE if layer == 0 else 2 * H
        layer_p = {}
        for direction in ('fwd', 'bwd'):
            w_ih = unif(next(keys), (4 * H, in_sz), k_lstm)
            w_hh = unif(next(keys), (4 * H, H), k_lstm)
            b_ih = unif(next(keys), (4 * H,), k_lstm)
            b_hh = unif(next(keys), (4 * H,), k_lstm)
            layer_p[direction] = dict(wih_t=w_ih.T, whh_t=w_hh.T,
                                      b=(b_ih + b_hh).reshape(1, 4 * H))
        lstm_layers.append(layer_p)

    params = {'lstm_layers': lstm_layers}
    # TODO(synk): layers 1..3 of the stacked BiLSTM never influence the module
    # output (forward consumes only h_n[0], h_n[1]), so the kernel runs layer 0 only.
    params['l0_fwd'] = lstm_layers[0]['fwd']
    params['l0_bwd'] = lstm_layers[0]['bwd']

    k_lin1 = 1.0 / math.sqrt(2 * H)
    w1 = unif(next(keys), (OUT_SIZE, 2 * H), k_lin1)
    b1 = unif(next(keys), (OUT_SIZE,), k_lin1)
    params['lin1_w'] = w1.T
    params['lin1_b'] = b1.reshape(1, OUT_SIZE)

    k_cls = 1.0 / math.sqrt(OUT_SIZE)
    wc = unif(next(keys), (num_classes, OUT_SIZE), k_cls)
    bc = unif(next(keys), (num_classes,), k_cls)
    params['cls_w'] = wc.T
    params['cls_b'] = bc.reshape(1, num_classes)
    return params


def _ref_forward(params, x):
    """Pure-JAX reference (unfused, same semantics) for correctness checking."""
    xs = jnp.transpose(x[1], (1, 0, 2)).astype(jnp.float32)
    S, B, _ = xs.shape
    H = HIDDEN

    def run_dir(p, seq):
        h = jnp.zeros((B, H), jnp.float32)
        c = jnp.zeros((B, H), jnp.float32)
        for t in range(S):
            g = seq[t] @ p['wih_t'] + h @ p['whh_t'] + p['b']
            i = jax.nn.sigmoid(g[:, :H])
            f = jax.nn.sigmoid(g[:, H:2 * H])
            gg = jnp.tanh(g[:, 2 * H:3 * H])
            o = jax.nn.sigmoid(g[:, 3 * H:])
            c = f * c + i * gg
            h = o * jnp.tanh(c)
        return h

    hf = run_dir(params['l0_fwd'], xs)
    hb = run_dir(params['l0_bwd'], xs[::-1])
    hcat = jnp.concatenate([hf, hb], axis=-1)
    feat = hcat @ params['lin1_w'] + params['lin1_b']
    pred = feat @ params['cls_w'] + params['cls_b']
    return feat, pred


if __name__ == "__main__":
    import numpy as np

    key = jax.random.PRNGKey(0)
    kp, kx, ka = jax.random.split(key, 3)

    B, S, num_classes = 2, 8, 7
    params = init_params(kp, num_classes=num_classes)

    video = jax.random.normal(kx, (B, S, IN_SIZE), jnp.float32)   # x[1] (used)
    audio = jax.random.normal(ka, (B, S, 74), jnp.float32)        # x[0] (unused by forward)
    x = (audio, video)

    out = mosei_v_cls_forward(params, x)
    pred = jax.block_until_ready(out['preds']['combined'])
    feat = jax.block_until_ready(out['features']['combined'])

    rfeat, rpred = _ref_forward(params, x)
    assert pred.shape == (B, num_classes) and feat.shape == (B, OUT_SIZE)
    assert np.allclose(np.asarray(feat), np.asarray(rfeat), atol=2e-4, rtol=2e-4)
    assert np.allclose(np.asarray(pred), np.asarray(rpred), atol=2e-4, rtol=2e-4)

    print("KERNEL_OK")
</pallas_src>

<mosaic_0001>
module attributes {stable_mosaic.version = 11 : i64} {
  func.func @_lstm_cls_kernel(%arg0: memref<16x35xf32, #tpu.memory_space<vmem>>, %arg1: memref<35x512xf32, #tpu.memory_space<vmem>>, %arg2: memref<1x512xf32, #tpu.memory_space<vmem>>, %arg3: memref<128x256xf32, #tpu.memory_space<vmem>>, %arg4: memref<128x64xf32, #tpu.memory_space<vmem>>, %arg5: memref<1x64xf32, #tpu.memory_space<vmem>>, %arg6: memref<128x7xf32, #tpu.memory_space<vmem>>, %arg7: memref<1x7xf32, #tpu.memory_space<vmem>>, %arg8: memref<2x64xf32, #tpu.memory_space<vmem>>, %arg9: memref<2x7xf32, #tpu.memory_space<vmem>>) attributes {dimension_semantics = [], scalar_prefetch = 0 : i64, scratch_operands = 0 : i64, tpu.core_type = #tpu.core_type<tc>} {
    %c0 = arith.constant 0 : index
    %c0_0 = arith.constant 0 : index
    %0 = vector.load %arg0[%c0, %c0_0] : memref<16x35xf32, #tpu.memory_space<vmem>>, vector<16x35xf32>
    %c0_1 = arith.constant 0 : index
    %c0_2 = arith.constant 0 : index
    %1 = vector.load %arg1[%c0_1, %c0_2] : memref<35x512xf32, #tpu.memory_space<vmem>>, vector<35x512xf32>
    %cst = arith.constant dense<0.000000e+00> : vector<16x512xf32>
    %2 = tpu.matmul %0, %1, %cst {dimension_numbers = #tpu.dot_dimension_numbers<[1], [0], [0], [1], [0, 0, 1, 1], [], []>} : vector<16x35xf32>, vector<35x512xf32>, vector<16x512xf32> -> vector<16x512xf32>
    %c0_3 = arith.constant 0 : index
    %c0_4 = arith.constant 0 : index
    %3 = vector.load %arg2[%c0_3, %c0_4] : memref<1x512xf32, #tpu.memory_space<vmem>>, vector<1x512xf32>
    %4 = vector.broadcast %3 : vector<1x512xf32> to vector<16x512xf32>
    %5 = arith.addf %2, %4 : vector<16x512xf32>
    %c0_5 = arith.constant 0 : index
    %c0_6 = arith.constant 0 : index
    %6 = vector.load %arg3[%c0_5, %c0_6] : memref<128x256xf32, #tpu.memory_space<vmem>>, vector<128x256xf32>
    %7 = tpu.iota {dimensions = array<i32: 0>} : vector<4x128xi32>
    %8 = tpu.iota {dimensions = array<i32: 1>} : vector<4x128xi32>
    %c2_i32 = arith.constant 2 : i32
    %9 = vector.broadcast %c2_i32 : i32 to vector<4x128xi32>
    %10 = arith.cmpi slt, %7, %9 : vector<4x128xi32>
    %c64_i32 = arith.constant 64 : i32
    %11 = vector.broadcast %c64_i32 : i32 to vector<4x128xi32>
    %12 = arith.cmpi slt, %8, %11 : vector<4x128xi32>
    %13 = arith.andi %10, %12 : vector<4x128xi1>
    %c2_i32_7 = arith.constant 2 : i32
    %14 = vector.broadcast %c2_i32_7 : i32 to vector<4x128xi32>
    %15 = arith.cmpi sge, %7, %14 : vector<4x128xi32>
    %c64_i32_8 = arith.constant 64 : i32
    %16 = vector.broadcast %c64_i32_8 : i32 to vector<4x128xi32>
    %17 = arith.cmpi sge, %8, %16 : vector<4x128xi32>
    %18 = arith.andi %15, %17 : vector<4x128xi1>
    %19 = arith.ori %13, %18 : vector<4x128xi1>
    %20 = arith.extui %19 : vector<4x128xi1> to vector<4x128xi32>
    %21 = arith.sitofp %20 : vector<4x128xi32> to vector<4x128xf32>
    %cst_9 = arith.constant 0.000000e+00 : f32
    %22 = vector.broadcast %cst_9 : f32 to vector<4x128xf32>
    %cst_10 = arith.constant 0.000000e+00 : f32
    %23 = vector.broadcast %cst_10 : f32 to vector<4x64xf32>
    %24 = vector.extract_strided_slice %5 {offsets = [0, 0], sizes = [2, 256], strides = [1, 1]} : vector<16x512xf32> to vector<2x256xf32>
    %25 = vector.extract_strided_slice %5 {offsets = [14, 256], sizes = [2, 256], strides = [1, 1]} : vector<16x512xf32> to vector<2x256xf32>
    %26 = tpu.concatenate %24, %25 in 0 : vector<2x256xf32>, vector<2x256xf32> -> vector<4x256xf32>
    %cst_11 = arith.constant dense<0.000000e+00> : vector<4x256xf32>
    %27 = tpu.matmul %22, %6, %cst_11 {dimension_numbers = #tpu.dot_dimension_numbers<[1], [0], [0], [1], [0, 0, 1, 1], [], []>} : vector<4x128xf32>, vector<128x256xf32>, vector<4x256xf32> -> vector<4x256xf32>
    %28 = arith.addf %26, %27 : vector<4x256xf32>
    %29 = arith.negf %28 : vector<4x256xf32>
    %30 = math.exp %29 : vector<4x256xf32>
    %cst_12 = arith.constant 1.000000e+00 : f32
    %31 = vector.broadcast %cst_12 : f32 to vector<4x256xf32>
    %32 = arith.addf %31, %30 : vector<4x256xf32>
    %33 = arith.divf %31, %32 : vector<4x256xf32>
    %34 = vector.extract_strided_slice %33 {offsets = [0, 0], sizes = [4, 64], strides = [1, 1]} : vector<4x256xf32> to vector<4x64xf32>
    %35 = vector.extract_strided_slice %33 {offsets = [0, 64], sizes = [4, 64], strides = [1, 1]} : vector<4x256xf32> to vector<4x64xf32>
    %36 = vector.extract_strided_slice %33 {offsets = [0, 192], sizes = [4, 64], strides = [1, 1]} : vector<4x256xf32> to vector<4x64xf32>
    %37 = vector.extract_strided_slice %28 {offsets = [0, 128], sizes = [4, 64], strides = [1, 1]} : vector<4x256xf32> to vector<4x64xf32>
    %38 = math.tanh %37 : vector<4x64xf32>
    %39 = arith.mulf %35, %23 : vector<4x64xf32>
    %40 = arith.mulf %34, %38 : vector<4x64xf32>
    %41 = arith.addf %39, %40 : vector<4x64xf32>
    %42 = math.tanh %41 : vector<4x64xf32>
    %43 = arith.mulf %36, %42 : vector<4x64xf32>
    %44 = tpu.concatenate %43, %43 in 1 : vector<4x64xf32>, vector<4x64xf32> -> vector<4x128xf32>
    %45 = arith.mulf %44, %21 : vector<4x128xf32>
    %46 = vector.extract_strided_slice %5 {offsets = [2, 0], sizes = [2, 256], strides = [1, 1]} : vector<16x512xf32> to vector<2x256xf32>
    %47 = vector.extract_strided_slice %5 {offsets = [12, 256], sizes = [2, 256], strides = [1, 1]} : vector<16x512xf32> to vector<2x256xf32>
    %48 = tpu.concatenate %46, %47 in 0 : vector<2x256xf32>, vector<2x256xf32> -> vector<4x256xf32>
    %cst_13 = arith.constant dense<0.000000e+00> : vector<4x256xf32>
    %49 = tpu.matmul %45, %6, %cst_13 {dimension_numbers = #tpu.dot_dimension_numbers<[1], [0], [0], [1], [0, 0, 1, 1], [], []>} : vector<4x128xf32>, vector<128x256xf32>, vector<4x256xf32> -> vector<4x256xf32>
    %50 = arith.addf %48, %49 : vector<4x256xf32>
    %51 = arith.negf %50 : vector<4x256xf32>
    %52 = math.exp %51 : vector<4x256xf32>
    %cst_14 = arith.constant 1.000000e+00 : f32
    %53 = vector.broadcast %cst_14 : f32 to vector<4x256xf32>
    %54 = arith.addf %53, %52 : vector<4x256xf32>
    %55 = arith.divf %53, %54 : vector<4x256xf32>
    %56 = vector.extract_strided_slice %55 {offsets = [0, 0], sizes = [4, 64], strides = [1, 1]} : vector<4x256xf32> to vector<4x64xf32>
    %57 = vector.extract_strided_slice %55 {offsets = [0, 64], sizes = [4, 64], strides = [1, 1]} : vector<4x256xf32> to vector<4x64xf32>
    %58 = vector.extract_strided_slice %55 {offsets = [0, 192], sizes = [4, 64], strides = [1, 1]} : vector<4x256xf32> to vector<4x64xf32>
    %59 = vector.extract_strided_slice %50 {offsets = [0, 128], sizes = [4, 64], strides = [1, 1]} : vector<4x256xf32> to vector<4x64xf32>
    %60 = math.tanh %59 : vector<4x64xf32>
    %61 = arith.mulf %57, %41 : vector<4x64xf32>
    %62 = arith.mulf %56, %60 : vector<4x64xf32>
    %63 = arith.addf %61, %62 : vector<4x64xf32>
    %64 = math.tanh %63 : vector<4x64xf32>
    %65 = arith.mulf %58, %64 : vector<4x64xf32>
    %66 = tpu.concatenate %65, %65 in 1 : vector<4x64xf32>, vector<4x64xf32> -> vector<4x128xf32>
    %67 = arith.mulf %66, %21 : vector<4x128xf32>
    %68 = vector.extract_strided_slice %5 {offsets = [4, 0], sizes = [2, 256], strides = [1, 1]} : vector<16x512xf32> to vector<2x256xf32>
    %69 = vector.extract_strided_slice %5 {offsets = [10, 256], sizes = [2, 256], strides = [1, 1]} : vector<16x512xf32> to vector<2x256xf32>
    %70 = tpu.concatenate %68, %69 in 0 : vector<2x256xf32>, vector<2x256xf32> -> vector<4x256xf32>
    %cst_15 = arith.constant dense<0.000000e+00> : vector<4x256xf32>
    %71 = tpu.matmul %67, %6, %cst_15 {dimension_numbers = #tpu.dot_dimension_numbers<[1], [0], [0], [1], [0, 0, 1, 1], [], []>} : vector<4x128xf32>, vector<128x256xf32>, vector<4x256xf32> -> vector<4x256xf32>
    %72 = arith.addf %70, %71 : vector<4x256xf32>
    %73 = arith.negf %72 : vector<4x256xf32>
    %74 = math.exp %73 : vector<4x256xf32>
    %cst_16 = arith.constant 1.000000e+00 : f32
    %75 = vector.broadcast %cst_16 : f32 to vector<4x256xf32>
    %76 = arith.addf %75, %74 : vector<4x256xf32>
    %77 = arith.divf %75, %76 : vector<4x256xf32>
    %78 = vector.extract_strided_slice %77 {offsets = [0, 0], sizes = [4, 64], strides = [1, 1]} : vector<4x256xf32> to vector<4x64xf32>
    %79 = vector.extract_strided_slice %77 {offsets = [0, 64], sizes = [4, 64], strides = [1, 1]} : vector<4x256xf32> to vector<4x64xf32>
    %80 = vector.extract_strided_slice %77 {offsets = [0, 192], sizes = [4, 64], strides = [1, 1]} : vector<4x256xf32> to vector<4x64xf32>
    %81 = vector.extract_strided_slice %72 {offsets = [0, 128], sizes = [4, 64], strides = [1, 1]} : vector<4x256xf32> to vector<4x64xf32>
    %82 = math.tanh %81 : vector<4x64xf32>
    %83 = arith.mulf %79, %63 : vector<4x64xf32>
    %84 = arith.mulf %78, %82 : vector<4x64xf32>
    %85 = arith.addf %83, %84 : vector<4x64xf32>
    %86 = math.tanh %85 : vector<4x64xf32>
    %87 = arith.mulf %80, %86 : vector<4x64xf32>
    %88 = tpu.concatenate %87, %87 in 1 : vector<4x64xf32>, vector<4x64xf32> -> vector<4x128xf32>
    %89 = arith.mulf %88, %21 : vector<4x128xf32>
    %90 = vector.extract_strided_slice %5 {offsets = [6, 0], sizes = [2, 256], strides = [1, 1]} : vector<16x512xf32> to vector<2x256xf32>
    %91 = vector.extract_strided_slice %5 {offsets = [8, 256], sizes = [2, 256], strides = [1, 1]} : vector<16x512xf32> to vector<2x256xf32>
    %92 = tpu.concatenate %90, %91 in 0 : vector<2x256xf32>, vector<2x256xf32> -> vector<4x256xf32>
    %cst_17 = arith.constant dense<0.000000e+00> : vector<4x256xf32>
    %93 = tpu.matmul %89, %6, %cst_17 {dimension_numbers = #tpu.dot_dimension_numbers<[1], [0], [0], [1], [0, 0, 1, 1], [], []>} : vector<4x128xf32>, vector<128x256xf32>, vector<4x256xf32> -> vector<4x256xf32>
    %94 = arith.addf %92, %93 : vector<4x256xf32>
    %95 = arith.negf %94 : vector<4x256xf32>
    %96 = math.exp %95 : vector<4x256xf32>
    %cst_18 = arith.constant 1.000000e+00 : f32
    %97 = vector.broadcast %cst_18 : f32 to vector<4x256xf32>
    %98 = arith.addf %97, %96 : vector<4x256xf32>
    %99 = arith.divf %97, %98 : vector<4x256xf32>
    %100 = vector.extract_strided_slice %99 {offsets = [0, 0], sizes = [4, 64], strides = [1, 1]} : vector<4x256xf32> to vector<4x64xf32>
    %101 = vector.extract_strided_slice %99 {offsets = [0, 64], sizes = [4, 64], strides = [1, 1]} : vector<4x256xf32> to vector<4x64xf32>
    %102 = vector.extract_strided_slice %99 {offsets = [0, 192], sizes = [4, 64], strides = [1, 1]} : vector<4x256xf32> to vector<4x64xf32>
    %103 = vector.extract_strided_slice %94 {offsets = [0, 128], sizes = [4, 64], strides = [1, 1]} : vector<4x256xf32> to vector<4x64xf32>
    %104 = math.tanh %103 : vector<4x64xf32>
    %105 = arith.mulf %101, %85 : vector<4x64xf32>
    %106 = arith.mulf %100, %104 : vector<4x64xf32>
    %107 = arith.addf %105, %106 : vector<4x64xf32>
    %108 = math.tanh %107 : vector<4x64xf32>
    %109 = arith.mulf %102, %108 : vector<4x64xf32>
    %110 = tpu.concatenate %109, %109 in 1 : vector<4x64xf32>, vector<4x64xf32> -> vector<4x128xf32>
    %111 = arith.mulf %110, %21 : vector<4x128xf32>
    %112 = vector.extract_strided_slice %5 {offsets = [8, 0], sizes = [2, 256], strides = [1, 1]} : vector<16x512xf32> to vector<2x256xf32>
    %113 = vector.extract_strided_slice %5 {offsets = [6, 256], sizes = [2, 256], strides = [1, 1]} : vector<16x512xf32> to vector<2x256xf32>
    %114 = tpu.concatenate %112, %113 in 0 : vector<2x256xf32>, vector<2x256xf32> -> vector<4x256xf32>
    %cst_19 = arith.constant dense<0.000000e+00> : vector<4x256xf32>
    %115 = tpu.matmul %111, %6, %cst_19 {dimension_numbers = #tpu.dot_dimension_numbers<[1], [0], [0], [1], [0, 0, 1, 1], [], []>} : vector<4x128xf32>, vector<128x256xf32>, vector<4x256xf32> -> vector<4x256xf32>
    %116 = arith.addf %114, %115 : vector<4x256xf32>
    %117 = arith.negf %116 : vector<4x256xf32>
    %118 = math.exp %117 : vector<4x256xf32>
    %cst_20 = arith.constant 1.000000e+00 : f32
    %119 = vector.broadcast %cst_20 : f32 to vector<4x256xf32>
    %120 = arith.addf %119, %118 : vector<4x256xf32>
    %121 = arith.divf %119, %120 : vector<4x256xf32>
    %122 = vector.extract_strided_slice %121 {offsets = [0, 0], sizes = [4, 64], strides = [1, 1]} : vector<4x256xf32> to vector<4x64xf32>
    %123 = vector.extract_strided_slice %121 {offsets = [0, 64], sizes = [4, 64], strides = [1, 1]} : vector<4x256xf32> to vector<4x64xf32>
    %124 = vector.extract_strided_slice %121 {offsets = [0, 192], sizes = [4, 64], strides = [1, 1]} : vector<4x256xf32> to vector<4x64xf32>
    %125 = vector.extract_strided_slice %116 {offsets = [0, 128], sizes = [4, 64], strides = [1, 1]} : vector<4x256xf32> to vector<4x64xf32>
    %126 = math.tanh %125 : vector<4x64xf32>
    %127 = arith.mulf %123, %107 : vector<4x64xf32>
    %128 = arith.mulf %122, %126 : vector<4x64xf32>
    %129 = arith.addf %127, %128 : vector<4x64xf32>
    %130 = math.tanh %129 : vector<4x64xf32>
    %131 = arith.mulf %124, %130 : vector<4x64xf32>
    %132 = tpu.concatenate %131, %131 in 1 : vector<4x64xf32>, vector<4x64xf32> -> vector<4x128xf32>
    %133 = arith.mulf %132, %21 : vector<4x128xf32>
    %134 = vector.extract_strided_slice %5 {offsets = [10, 0], sizes = [2, 256], strides = [1, 1]} : vector<16x512xf32> to vector<2x256xf32>
    %135 = vector.extract_strided_slice %5 {offsets = [4, 256], sizes = [2, 256], strides = [1, 1]} : vector<16x512xf32> to vector<2x256xf32>
    %136 = tpu.concatenate %134, %135 in 0 : vector<2x256xf32>, vector<2x256xf32> -> vector<4x256xf32>
    %cst_21 = arith.constant dense<0.000000e+00> : vector<4x256xf32>
    %137 = tpu.matmul %133, %6, %cst_21 {dimension_numbers = #tpu.dot_dimension_numbers<[1], [0], [0], [1], [0, 0, 1, 1], [], []>} : vector<4x128xf32>, vector<128x256xf32>, vector<4x256xf32> -> vector<4x256xf32>
    %138 = arith.addf %136, %137 : vector<4x256xf32>
    %139 = arith.negf %138 : vector<4x256xf32>
    %140 = math.exp %139 : vector<4x256xf32>
    %cst_22 = arith.constant 1.000000e+00 : f32
    %141 = vector.broadcast %cst_22 : f32 to vector<4x256xf32>
    %142 = arith.addf %141, %140 : vector<4x256xf32>
    %143 = arith.divf %141, %142 : vector<4x256xf32>
    %144 = vector.extract_strided_slice %143 {offsets = [0, 0], sizes = [4, 64], strides = [1, 1]} : vector<4x256xf32> to vector<4x64xf32>
    %145 = vector.extract_strided_slice %143 {offsets = [0, 64], sizes = [4, 64], strides = [1, 1]} : vector<4x256xf32> to vector<4x64xf32>
    %146 = vector.extract_strided_slice %143 {offsets = [0, 192], sizes = [4, 64], strides = [1, 1]} : vector<4x256xf32> to vector<4x64xf32>
    %147 = vector.extract_strided_slice %138 {offsets = [0, 128], sizes = [4, 64], strides = [1, 1]} : vector<4x256xf32> to vector<4x64xf32>
    %148 = math.tanh %147 : vector<4x64xf32>
    %149 = arith.mulf %145, %129 : vector<4x64xf32>
    %150 = arith.mulf %144, %148 : vector<4x64xf32>
    %151 = arith.addf %149, %150 : vector<4x64xf32>
    %152 = math.tanh %151 : vector<4x64xf32>
    %153 = arith.mulf %146, %152 : vector<4x64xf32>
    %154 = tpu.concatenate %153, %153 in 1 : vector<4x64xf32>, vector<4x64xf32> -> vector<4x128xf32>
    %155 = arith.mulf %154, %21 : vector<4x128xf32>
    %156 = vector.extract_strided_slice %5 {offsets = [12, 0], sizes = [2, 256], strides = [1, 1]} : vector<16x512xf32> to vector<2x256xf32>
    %157 = vector.extract_strided_slice %5 {offsets = [2, 256], sizes = [2, 256], strides = [1, 1]} : vector<16x512xf32> to vector<2x256xf32>
    %158 = tpu.concatenate %156, %157 in 0 : vector<2x256xf32>, vector<2x256xf32> -> vector<4x256xf32>
    %cst_23 = arith.constant dense<0.000000e+00> : vector<4x256xf32>
    %159 = tpu.matmul %155, %6, %cst_23 {dimension_numbers = #tpu.dot_dimension_numbers<[1], [0], [0], [1], [0, 0, 1, 1], [], []>} : vector<4x128xf32>, vector<128x256xf32>, vector<4x256xf32> -> vector<4x256xf32>
    %160 = arith.addf %158, %159 : vector<4x256xf32>
    %161 = arith.negf %160 : vector<4x256xf32>
    %162 = math.exp %161 : vector<4x256xf32>
    %cst_24 = arith.constant 1.000000e+00 : f32
    %163 = vector.broadcast %cst_24 : f32 to vector<4x256xf32>
    %164 = arith.addf %163, %162 : vector<4x256xf32>
    %165 = arith.divf %163, %164 : vector<4x256xf32>
    %166 = vector.extract_strided_slice %165 {offsets = [0, 0], sizes = [4, 64], strides = [1, 1]} : vector<4x256xf32> to vector<4x64xf32>
    %167 = vector.extract_strided_slice %165 {offsets = [0, 64], sizes = [4, 64], strides = [1, 1]} : vector<4x256xf32> to vector<4x64xf32>
    %168 = vector.extract_strided_slice %165 {offsets = [0, 192], sizes = [4, 64], strides = [1, 1]} : vector<4x256xf32> to vector<4x64xf32>
    %169 = vector.extract_strided_slice %160 {offsets = [0, 128], sizes = [4, 64], strides = [1, 1]} : vector<4x256xf32> to vector<4x64xf32>
    %170 = math.tanh %169 : vector<4x64xf32>
    %171 = arith.mulf %167, %151 : vector<4x64xf32>
    %172 = arith.mulf %166, %170 : vector<4x64xf32>
    %173 = arith.addf %171, %172 : vector<4x64xf32>
    %174 = math.tanh %173 : vector<4x64xf32>
    %175 = arith.mulf %168, %174 : vector<4x64xf32>
    %176 = tpu.concatenate %175, %175 in 1 : vector<4x64xf32>, vector<4x64xf32> -> vector<4x128xf32>
    %177 = arith.mulf %176, %21 : vector<4x128xf32>
    %178 = vector.extract_strided_slice %5 {offsets = [14, 0], sizes = [2, 256], strides = [1, 1]} : vector<16x512xf32> to vector<2x256xf32>
    %179 = vector.extract_strided_slice %5 {offsets = [0, 256], sizes = [2, 256], strides = [1, 1]} : vector<16x512xf32> to vector<2x256xf32>
    %180 = tpu.concatenate %178, %179 in 0 : vector<2x256xf32>, vector<2x256xf32> -> vector<4x256xf32>
    %cst_25 = arith.constant dense<0.000000e+00> : vector<4x256xf32>
    %181 = tpu.matmul %177, %6, %cst_25 {dimension_numbers = #tpu.dot_dimension_numbers<[1], [0], [0], [1], [0, 0, 1, 1], [], []>} : vector<4x128xf32>, vector<128x256xf32>, vector<4x256xf32> -> vector<4x256xf32>
    %182 = arith.addf %180, %181 : vector<4x256xf32>
    %183 = arith.negf %182 : vector<4x256xf32>
    %184 = math.exp %183 : vector<4x256xf32>
    %cst_26 = arith.constant 1.000000e+00 : f32
    %185 = vector.broadcast %cst_26 : f32 to vector<4x256xf32>
    %186 = arith.addf %185, %184 : vector<4x256xf32>
    %187 = arith.divf %185, %186 : vector<4x256xf32>
    %188 = vector.extract_strided_slice %187 {offsets = [0, 0], sizes = [4, 64], strides = [1, 1]} : vector<4x256xf32> to vector<4x64xf32>
    %189 = vector.extract_strided_slice %187 {offsets = [0, 64], sizes = [4, 64], strides = [1, 1]} : vector<4x256xf32> to vector<4x64xf32>
    %190 = vector.extract_strided_slice %187 {offsets = [0, 192], sizes = [4, 64], strides = [1, 1]} : vector<4x256xf32> to vector<4x64xf32>
    %191 = vector.extract_strided_slice %182 {offsets = [0, 128], sizes = [4, 64], strides = [1, 1]} : vector<4x256xf32> to vector<4x64xf32>
    %192 = math.tanh %191 : vector<4x64xf32>
    %193 = arith.mulf %189, %173 : vector<4x64xf32>
    %194 = arith.mulf %188, %192 : vector<4x64xf32>
    %195 = arith.addf %193, %194 : vector<4x64xf32>
    %196 = math.tanh %195 : vector<4x64xf32>
    %197 = arith.mulf %190, %196 : vector<4x64xf32>
    %198 = vector.extract_strided_slice %197 {offsets = [0, 0], sizes = [2, 64], strides = [1, 1]} : vector<4x64xf32> to vector<2x64xf32>
    %199 = vector.extract_strided_slice %197 {offsets = [2, 0], sizes = [2, 64], strides = [1, 1]} : vector<4x64xf32> to vector<2x64xf32>
    %200 = tpu.concatenate %198, %199 in 1 : vector<2x64xf32>, vector<2x64xf32> -> vector<2x128xf32>
    %c0_27 = arith.constant 0 : index
    %c0_28 = arith.constant 0 : index
    %201 = vector.load %arg4[%c0_27, %c0_28] : memref<128x64xf32, #tpu.memory_space<vmem>>, vector<128x64xf32>
    %cst_29 = arith.constant dense<0.000000e+00> : vector<2x64xf32>
    %202 = tpu.matmul %200, %201, %cst_29 {dimension_numbers = #tpu.dot_dimension_numbers<[1], [0], [0], [1], [0, 0, 1, 1], [], []>} : vector<2x128xf32>, vector<128x64xf32>, vector<2x64xf32> -> vector<2x64xf32>
    %c0_30 = arith.constant 0 : index
    %c0_31 = arith.constant 0 : index
    %203 = vector.load %arg5[%c0_30, %c0_31] : memref<1x64xf32, #tpu.memory_space<vmem>>, vector<1x64xf32>
    %204 = vector.broadcast %203 : vector<1x64xf32> to vector<2x64xf32>
    %205 = arith.addf %202, %204 : vector<2x64xf32>
    %c0_32 = arith.constant 0 : index
    %c0_33 = arith.constant 0 : index
    %206 = vector.load %arg6[%c0_32, %c0_33] : memref<128x7xf32, #tpu.memory_space<vmem>>, vector<128x7xf32>
    %cst_34 = arith.constant dense<0.000000e+00> : vector<2x7xf32>
    %207 = tpu.matmul %200, %206, %cst_34 {dimension_numbers = #tpu.dot_dimension_numbers<[1], [0], [0], [1], [0, 0, 1, 1], [], []>} : vector<2x128xf32>, vector<128x7xf32>, vector<2x7xf32> -> vector<2x7xf32>
    %c0_35 = arith.constant 0 : index
    %c0_36 = arith.constant 0 : index
    %208 = vector.load %arg7[%c0_35, %c0_36] : memref<1x7xf32, #tpu.memory_space<vmem>>, vector<1x7xf32>
    %209 = vector.broadcast %208 : vector<1x7xf32> to vector<2x7xf32>
    %210 = arith.addf %207, %209 : vector<2x7xf32>
    %c0_37 = arith.constant 0 : index
    %c0_38 = arith.constant 0 : index
    %211 = vector.load %arg8[%c0_37, %c0_38] : memref<2x64xf32, #tpu.memory_space<vmem>>, vector<2x64xf32>
    tpu.vector_store %arg8[%c0_37, %c0_38], %205 {strides = array<i32>} : memref<2x64xf32, #tpu.memory_space<vmem>>, vector<2x64xf32>,
    %c0_39 = arith.constant 0 : index
    %c0_40 = arith.constant 0 : index
    %212 = vector.load %arg9[%c0_39, %c0_40] : memref<2x7xf32, #tpu.memory_space<vmem>>, vector<2x7xf32>
    tpu.vector_store %arg9[%c0_39, %c0_40], %210 {strides = array<i32>} : memref<2x7xf32, #tpu.memory_space<vmem>>, vector<2x7xf32>,
    return
  }
}

</mosaic_0001>

<bundles_post_ra>
// kernel: tpu_custom_call.1
= control target key start
LH: loop header
LB: loop body
LE: loop exit
PB: predicated region body
PF: predicated region fallthrough
CT: control target
= control target key end

     0   :  { %15 = vsyncpa [#allocation3], 0  ;;  %s2655_s0 = inlined_call_operand.vmem [shape: f32[16,35], index: 0, kind: input, shape index: {}]   ;;  %s2656_s1 = inlined_call_operand.hbm [shape: f32[35,512], index: 1, kind: input, shape index: {}]   ;;  %s2657_s2 = inlined_call_operand.vmem [shape: f32[1,512], index: 2, kind: input, shape index: {}]   ;;  %s2658_s3 = inlined_call_operand.vmem [shape: f32[128,256], index: 3, kind: input, shape index: {}]   ;;  %s2659_s4 = inlined_call_operand.vmem [shape: f32[128,64], index: 4, kind: input, shape index: {}]   ;;  %s2660_s5 = inlined_call_operand.vmem [shape: f32[1,64], index: 5, kind: input, shape index: {}]   ;;  %s2661_s6 = inlined_call_operand.vmem [shape: f32[128,7], index: 6, kind: input, shape index: {}]   ;;  %s2662_s7 = inlined_call_operand.vmem [shape: f32[1,7], index: 7, kind: input, shape index: {}]   ;;  %s2663_s8 = inlined_call_operand.hbm [shape: f32[2,64], index: 8, kind: output, shape index: {0}]   ;;  %s2664_s9 = inlined_call_operand.hbm [shape: f32[2,7], index: 9, kind: output, shape index: {1}]  }
   0x1   :  { %16 = vsyncpa [#allocation4], 0 }
   0x2   :  { %17 = vsyncpa [#allocation7], 0  ;;  %s2040_s30 = smov [#allocation2]   ;;  %s1968_s13 = scalar_lea.hbm %s2656_s1, 2560 }
   0x3   :  { %s25_s10 = sshll.u32 %s2040_s30, 4  ;;  %p1969_p0 = scmp.ne.s32.totalorder %s2656_s1, %s1968_s13  ;;  %s26_s10 = int_to_ptr.vmem [resolvable:$true] %s25_s10 }
   0x4   :  { %p1972_p1 = scmp.lt.u32.totalorder %s1968_s13, %s2656_s1 }
   0x6   :  { %p1974_p2 = pnand %p1972_p1, %p1969_p0 }
   0x8   :  { %1977 = shalt.err (!%p1974_p2)
}
   0x9   :  { %s1978_s18 = scalar_lea.vmem %s26_s10, 2560  ;;  %p1983_p4 = scmp.lt.s32.totalorder %s26_s10, %s26_s10 }
   0xa   :  { %p1979_p3 = scmp.ne.s32.totalorder %s26_s10, %s1978_s18  ;;  %p1984_p5 = scmp.lt.s32.totalorder %s1978_s18, %s1978_s18 }
   0xc   :  { %p1985_p6 = por %p1984_p5, %p1983_p4 }
   0xe   :  { %p1986_p7 = pnand %p1985_p6, %p1979_p3 }
  0x10   :  { %1989 = shalt.err (!%p1986_p7)
}
  0x11   :  { %s2041_s19 = smov 512   ;;  %s2042_s20 = smov 32  }
  0x12   :  { %31 = dma.hbm_to_vmem [thread:$0]  %s2656_s1, 2560, %s26_s10, [#allocation3], %s2041_s19, %s2041_s19, %s2042_s20  }
  0x13   :  { %2034 = dma.done.wait [#allocation3], 2560  }
  0x14   :  { %2035 = vsyncadd [#allocation3], 4294964736  ;;  %v2043_v0 = vmov 0.0   ;;  %v50_v1 = vld [vmem:[#allocation2 + $0x8] sm:$0xff]  ;;  %v52_v3 = vld [vmem:[#allocation2 + $0x18] sm:$0xff]  ;;  %vm98_vm0 = vcmask 1042432  }
  0x15   :  { %175 = vmatprep.mubr.f32.mxu0 %v2043_v0  ;;  %252 = vmatprep.mubr.f32.mxu1 %v2043_v0  ;;  %v54_v2 = vld [vmem:[#allocation2 + $0x28] sm:$0xff]  ;;  %v56_v5 = vld [vmem:[#allocation2 + $0x38] sm:$0xff]  ;;  %v49_v6 = vld [vmem:[#allocation2] sm:$0xff]  ;;  %vm91_vm1 = vcmask 285696   ;;  %vm316_vm2 = vcmask 1041408   ;;  %vm418_vm10 = vcmask 523264  }
  0x16   :  { %v1543_v4 = vpack.c.bf16 %v54_v2, %v50_v1  ;;  %v53_v7 = vld [vmem:[#allocation2 + $0x20] sm:$0xff]  ;;  %v1551_v8 = vpack.c.bf16 %v56_v5, %v52_v3  ;;  %v51_v10 = vld [vmem:[#allocation2 + $0x10] sm:$0xff]  ;;  %v58_v12 = vld [vmem:[#allocation2 + $0x48] sm:$0xff]  ;;  %vm2046_vm11 = vmmov 0   ;;  %s2047_s19 = smov [#allocation5]   ;;  %s2048_s21 = smov [#allocation6]  }
  0x17   :  { %v1545_v9 = vpack.c.bf16 %v53_v7, %v49_v6  ;;  %v55_v11 = vld [vmem:[#allocation2 + $0x30] sm:$0xff]  ;;  %v62_v14 = vld [vmem:[#allocation2 + $0x68] sm:$0xff]  ;;  %v60_v15 = vld [vmem:[#allocation2 + $0x58] sm:$0xff]  ;;  %s1389_s20 = sshll.u32 %s2047_s19, 4  ;;  %s1399_s22 = sshll.u32 %s2048_s21, 4  ;;  %vm1379_vm12 = vcmask 517120   ;;  %s1390_s20 = int_to_ptr.vmem [resolvable:$true] %s1389_s20  ;;  %s1400_s22 = int_to_ptr.vmem [resolvable:$true] %s1399_s22 }
  0x18   :  { %1544 = vmatprep.subr.bf16.mxu0 %v1543_v4  ;;  %v1553_v13 = vpack.c.bf16 %v55_v11, %v51_v10  ;;  %v64_v16 = vld [vmem:[#allocation2 + $0x78] sm:$0xff]  ;;  %1552 = vmatprep.subr.bf16.mxu1 %v1551_v8  ;;  %v1547_v17 = vpack.c.bf16 %v62_v14, %v58_v12  ;;  %v57_v19 = vld [vmem:[#allocation2 + $0x40] sm:$0xff]  ;;  %v59_v21 = vld [vmem:[#allocation2 + $0x50] sm:$0xff]  ;;  %vm1381_vm13 = vcmask 50176   ;;  %p1995_p9 = scmp.lt.s32.totalorder %s1390_s20, %s1390_s20 }
  0x19   :  { %1546 = vmatpush1.bf16.msra.mxu0 %v1545_v9  ;;  %v1555_v18 = vpack.c.bf16 %v64_v16, %v60_v15  ;;  %v61_v20 = vld [vmem:[#allocation2 + $0x60] sm:$0xff]  ;;  %v63_v23 = vld [vmem:[#allocation2 + $0x70] sm:$0xff]  ;;  %v66_v25 = vld [vmem:[#allocation2 + $0x88] sm:$0x7]  ;;  %v71_v16 = vlaneseq }
  0x1a   :  { %1554 = vmatpush1.bf16.msra.mxu1 %v1553_v13  ;;  %v1549_v22 = vpack.c.bf16 %v61_v20, %v57_v19  ;;  %1548 = vmatprep.subr.bf16.mxu0 %v1547_v17  ;;  %v1557_v24 = vpack.c.bf16 %v63_v23, %v59_v21  ;;  %v68_v26 = vld [vmem:[#allocation2 + $0x98] sm:$0x7]  ;;  %v266_v27 = vld [vmem:[%s2658_s3 + $0x8] sm:$0xff]  ;;  %v265_v29 = vld [vmem:[%s2658_s3] sm:$0xff] }
  0x1b   :  { %1556 = vmatprep.subr.bf16.mxu1 %v1555_v18  ;;  %v268_v28 = vld [vmem:[%s2658_s3 + $0x18] sm:$0xff]  ;;  %v267_v30 = vld [vmem:[%s2658_s3 + $0x10] sm:$0xff]  ;;  %v65_v31 = vld [vmem:[#allocation2 + $0x80] sm:$0x7]  ;;  %v2312_v17 = vshrl.u32 %v71_v16, 7 }
  0x1c   :  { %v270_v32 = vld [vmem:[%s2658_s3 + $0x28] sm:$0xff]  ;;  %v272_v33 = vld [vmem:[%s2658_s3 + $0x38] sm:$0xff]  ;;  %v67_v34 = vld [vmem:[#allocation2 + $0x90] sm:$0x7]  ;;  %v2136_v36 = vpack.c.bf16 %v268_v28, %v266_v27  ;;  %v2138_v37 = vpack.c.bf16 %v267_v30, %v265_v29 }
  0x1d   :  { %1550 = vmatpush1.bf16.msra.mxu0 %v1549_v22  ;;  %v47_v35 = vld [vmem:[%s2655_s0] sm:$0xff]  ;;  %v2141_v38 = vpack.c.bf16 %v272_v33, %v270_v32  ;;  %v271_v40 = vld [vmem:[%s2658_s3 + $0x30] sm:$0xff]  ;;  %v274_v41 = vld [vmem:[%s2658_s3 + $0x48] sm:$0xff]  ;;  %v73_v18 = vsub.s32 0, %v2312_v17  ;;  %v77_v20 = vsub.s32 1, %v2312_v17  ;;  %v81_v21 = vsub.s32 2, %v2312_v17 }
  0x1e   :  { %1558 = vmatpush1.bf16.msra.mxu1 %v1557_v24  ;;  %1412 = vmatprep.subr.msk.mxu0 %vm98_vm0, %v66_v25  ;;  %v269_v39 = vld [vmem:[%s2658_s3 + $0x20] sm:$0xff]  ;;  %v276_v42 = vld [vmem:[%s2658_s3 + $0x58] sm:$0xff]  ;;  %v48_v43 = vld [vmem:[%s2655_s0 + $0x8] sm:$0xff]  ;;  %v85_v23 = vsub.s32 3, %v2312_v17  ;;  %vm301_vm3 = vcmp.lt.s32.totalorder %v2312_v17, 2  ;;  %vm304_vm5 = vcmp.ge.s32.totalorder %v2312_v17, 2 }
  0x1f   :  { %1416 = vmatprep.subr.msk.mxu1 %vm98_vm0, %v68_v26  ;;  %v2164_v44 = vpack.c.bf16 %v271_v40, %v269_v39  ;;  %v2167_v45 = vpack.c.bf16 %v276_v42, %v274_v41  ;;  %v273_v46 = vld [vmem:[%s2658_s3 + $0x40] sm:$0xff]  ;;  %v275_v47 = vld [vmem:[%s2658_s3 + $0x50] sm:$0xff]  ;;  %v278_v48 = vld [vmem:[%s2658_s3 + $0x68] sm:$0xff] }
  0x20   :  { %v280_v49 = vld [vmem:[%s2658_s3 + $0x78] sm:$0xff]  ;;  %v2187_v50 = vpack.c.bf16 %v275_v47, %v273_v46  ;;  %v277_v52 = vld [vmem:[%s2658_s3 + $0x60] sm:$0xff]  ;;  %v279_v53 = vld [vmem:[%s2658_s3 + $0x70] sm:$0xff] }
  0x21   :  { %1413 = vmatpush1.msk.msra.mxu0 %vm98_vm0, %v65_v31  ;;  %v2191_v51 = vpack.c.bf16 %v280_v49, %v278_v48  ;;  %v282_v54 = vld [vmem:[%s2658_s3 + $0x88] sm:$0xff]  ;;  %v284_v55 = vld [vmem:[%s2658_s3 + $0x98] sm:$0xff]  ;;  %v2208_v56 = vpack.c.bf16 %v279_v53, %v277_v52  ;;  %v281_v58 = vld [vmem:[%s2658_s3 + $0x80] sm:$0xff] }
  0x22   :  { %1417 = vmatpush1.msk.msra.mxu1 %vm98_vm0, %v67_v34  ;;  %1414 = vmatmul.mubr.msk.f32.vlgmr.msra.gmra.mrb[0].mxu0 %vm91_vm1, %v47_v35  ;;  %v2212_v57 = vpack.c.bf16 %v284_v55, %v282_v54  ;;  %v283_v59 = vld [vmem:[%s2658_s3 + $0x90] sm:$0xff]  ;;  %v286_v60 = vld [vmem:[%s2658_s3 + $0xa8] sm:$0xff]  ;;  %v288_v61 = vld [vmem:[%s2658_s3 + $0xb8] sm:$0xff] }
  0x23   :  { %1418 = vmatmul.mubr.msk.f32.vlgmr.msra.gmra.mrb[0].mxu1 %vm91_vm1, %v47_v35  ;;  %1560 = vmatprep.subr.bf16.mxu0 %v2136_v36  ;;  %v2228_v62 = vpack.c.bf16 %v283_v59, %v281_v58  ;;  %v2232_v63 = vpack.c.bf16 %v288_v61, %v286_v60  ;;  %v285_v1 = vld [vmem:[%s2658_s3 + $0xa0] sm:$0xff]  ;;  %v287_v2 = vld [vmem:[%s2658_s3 + $0xb0] sm:$0xff]  ;;  %v290_v3 = vld [vmem:[%s2658_s3 + $0xc8] sm:$0xff] }
  0x24   :  { %1562 = vmatpush1.bf16.msra.mxu0 %v2138_v37  ;;  %258 = vmatprep.mubr.f32.mxu1 %v2043_v0  ;;  %v292_v4 = vld [vmem:[%s2658_s3 + $0xd8] sm:$0xff]  ;;  %v2248_v5 = vpack.c.bf16 %v287_v2, %v285_v1  ;;  %v289_v7 = vld [vmem:[%s2658_s3 + $0xc0] sm:$0xff]  ;;  %v291_v8 = vld [vmem:[%s2658_s3 + $0xd0] sm:$0xff] }
  0x25   :  { %1564 = vmatprep.subr.bf16.mxu0 %v2141_v38  ;;  %181 = vmatprep.mubr.f32.mxu0 %v2043_v0  ;;  %v2252_v6 = vpack.c.bf16 %v292_v4, %v290_v3  ;;  %v294_v9 = vld [vmem:[%s2658_s3 + $0xe8] sm:$0xff]  ;;  %v296_v10 = vld [vmem:[%s2658_s3 + $0xf8] sm:$0xff]  ;;  %v2268_v11 = vpack.c.bf16 %v291_v8, %v289_v7  ;;  %v293_v13 = vld [vmem:[%s2658_s3 + $0xe0] sm:$0xff] }
  0x26   :  { %1415 = vmatmul.mubr.msk.f32.gmra.mrb[2].mxu0 %vm91_vm1, %v48_v43  ;;  %1592 = vmatprep.subr.bf16.mxu1 %v2136_v36  ;;  %v2272_v12 = vpack.c.bf16 %v296_v10, %v294_v9  ;;  %v295_v14 = vld [vmem:[%s2658_s3 + $0xf0] sm:$0xff]  ;;  %v69_v19 = vld [vmem:[%s2657_s2] sm:$0xf]  ;;  %s2044_s2 = smov 64  }
  0x27   :  { %1419 = vmatmul.mubr.msk.f32.gmra.mrb[2].mxu1 %vm91_vm1, %v48_v43  ;;  %383 = vmatprep.mubr.f32.mxu0 %v2043_v0  ;;  %v2282_v15 = vpack.c.bf16 %v295_v14, %v293_v13  ;;  %v74_v22 = vrot.slane %v69_v19, %v73_v18  ;;  %v78_v24 = vrot.slane %v69_v19, %v77_v20 }
  0x28   :  { %1566 = vmatpush1.bf16.msra.mxu0 %v2164_v44  ;;  %1594 = vmatpush1.bf16.msra.mxu1 %v2138_v37  ;;  %v82_v26 = vrot.slane %v69_v19, %v81_v21  ;;  %v86_v30 = vrot.slane %v69_v19, %v85_v23 }
  0x29   :  { %1568 = vmatprep.subr.bf16.mxu0 %v2167_v45  ;;  %1596 = vmatprep.subr.bf16.mxu1 %v2141_v38 }
  0x2a   :  { %497 = vmatprep.mubr.f32.mxu1 %v2043_v0 }
  0x2c   :  { %1570 = vmatpush1.bf16.msra.mxu0 %v2187_v50  ;;  %1598 = vmatpush1.bf16.msra.mxu1 %v2164_v44 }
  0x2d   :  { %1572 = vmatprep.subr.bf16.mxu0 %v2191_v51  ;;  %1600 = vmatprep.subr.bf16.mxu1 %v2167_v45 }
  0x30   :  { %1574 = vmatpush1.bf16.msra.mxu0 %v2208_v56  ;;  %1602 = vmatpush1.bf16.msra.mxu1 %v2187_v50 }
  0x31   :  { %1576 = vmatprep.subr.bf16.mxu0 %v2212_v57  ;;  %1604 = vmatprep.subr.bf16.mxu1 %v2191_v51 }
  0x34   :  { %1578 = vmatpush1.bf16.msra.mxu0 %v2228_v62  ;;  %1606 = vmatpush1.bf16.msra.mxu1 %v2208_v56 }
  0x35   :  { %1580 = vmatprep.subr.bf16.mxu0 %v2232_v63  ;;  %1608 = vmatprep.subr.bf16.mxu1 %v2212_v57 }
  0x38   :  { %1582 = vmatpush1.bf16.msra.mxu0 %v2248_v5  ;;  %1610 = vmatpush1.bf16.msra.mxu1 %v2228_v62 }
  0x39   :  { %1584 = vmatprep.subr.bf16.mxu0 %v2252_v6  ;;  %1612 = vmatprep.subr.bf16.mxu1 %v2232_v63 }
  0x3c   :  { %1586 = vmatpush1.bf16.msra.mxu0 %v2268_v11  ;;  %1614 = vmatpush1.bf16.msra.mxu1 %v2248_v5 }
  0x3d   :  { %1588 = vmatprep.subr.bf16.mxu0 %v2272_v12  ;;  %1616 = vmatprep.subr.bf16.mxu1 %v2252_v6 }
  0x40   :  { %1590 = vmatpush1.bf16.msra.mxu0 %v2282_v15  ;;  %1618 = vmatpush1.bf16.msra.mxu1 %v2268_v11 }
  0x41   :  { %1620 = vmatprep.subr.bf16.mxu1 %v2272_v12  ;;  %1624 = vmatprep.subr.bf16.mxu0 %v2136_v36 }
  0x43   :  { %384 = vmatmul.mubr.f32.vlgmr.msra.gmra.mrb[4].mxu0 %v2043_v0 }
  0x44   :  { %1622 = vmatpush1.bf16.msra.mxu1 %v2282_v15  ;;  %1626 = vmatpush1.bf16.msra.mxu0 %v2138_v37 }
  0x45   :  { %1628 = vmatprep.subr.bf16.mxu0 %v2141_v38  ;;  %604 = vmatprep.mubr.f32.mxu0 %v2043_v0 }
  0x46   :  { %1656 = vmatprep.subr.bf16.mxu1 %v2136_v36 }
  0x48   :  { %1630 = vmatpush1.bf16.msra.mxu0 %v2164_v44 }
  0x49   :  { %1632 = vmatprep.subr.bf16.mxu0 %v2167_v45 }
  0x4c   :  { %1634 = vmatpush1.bf16.msra.mxu0 %v2187_v50 }
  0x4d   :  { %1636 = vmatprep.subr.bf16.mxu0 %v2191_v51 }
  0x50   :  { %1638 = vmatpush1.bf16.msra.mxu0 %v2208_v56 }
  0x51   :  { %1640 = vmatprep.subr.bf16.mxu0 %v2212_v57 }
  0x54   :  { %1642 = vmatpush1.bf16.msra.mxu0 %v2228_v62 }
  0x55   :  { %1644 = vmatprep.subr.bf16.mxu0 %v2232_v63 }
  0x58   :  { %1646 = vmatpush1.bf16.msra.mxu0 %v2248_v5 }
  0x59   :  { %1648 = vmatprep.subr.bf16.mxu0 %v2252_v6 }
  0x5c   :  { %1650 = vmatpush1.bf16.msra.mxu0 %v2268_v11 }
  0x5d   :  { %1652 = vmatprep.subr.bf16.mxu0 %v2272_v12 }
  0x60   :  { %1654 = vmatpush1.bf16.msra.mxu0 %v2282_v15 }
  0x61   :  { %1688 = vmatprep.subr.bf16.mxu0 %v2136_v36 }
  0xf5   :  { %v177_v25 = vpop.f32.mrb[0].mxu0 }
  0xf6   :  { %v178_v27 = vadd.f32 %v177_v25, %v74_v22  ;;  %v179_v28 = vpop.f32.mrb[1].mxu0  ;;  %v254_v29 = vpop.f32.mrb[0].mxu1 }
  0xf7   :  { %v180_v31 = vadd.f32 %v179_v28, %v78_v24  ;;  %v255_v32 = vadd.f32 %v254_v29, %v82_v26  ;;  %v256_v33 = vpop.f32.mrb[1].mxu1 }
  0xf8   :  { %v257_v34 = vadd.f32 %v256_v33, %v86_v30  ;;  %v423_v35 = vrot.slane %v178_v27, 2  ;;  %v534_v39 = vrot.slane %v178_v27, 4  ;;  %v641_v40 = vrot.slane %v178_v27, 6 }
  0xf9   :  { %v183_v41 = vpop.f32.mrb[2].mxu0  ;;  %v424_v42 = vrot.slane %v180_v31, 2  ;;  %v535_v43 = vrot.slane %v180_v31, 4  ;;  %v642_v46 = vrot.slane %v180_v31, 6  ;;  %v754_v47 = vrot.slane %v255_v32, 4 }
  0xfa   :  { %v260_v48 = vpop.f32.mrb[2].mxu1  ;;  %v184_v49 = vadd.f32 %v183_v41, %v74_v22  ;;  %v185_v52 = vpop.f32.mrb[3].mxu0  ;;  %v755_v53 = vrot.slane %v257_v34, 4  ;;  %v867_v54 = vrot.slane %v255_v32, 2  ;;  %v868_v55 = vrot.slane %v257_v34, 2 }
  0xfb   :  { %v261_v58 = vadd.f32 %v260_v48, %v82_v26  ;;  %v262_v59 = vpop.f32.mrb[3].mxu1  ;;  %v186_v60 = vadd.f32 %v185_v52, %v78_v24  ;;  %v1085_v61 = vrot.slane %v255_v32, 6  ;;  %v1086_v1 = vrot.slane %v257_v34, 6 }
  0xfc   :  { %v263_v2 = vadd.f32 %v262_v59, %v86_v30  ;;  %v2322_v3 = vsel %vm316_vm2, %v184_v49, %v754_v47  ;;  %v863_v4 = vrot.slane %v184_v49, 2  ;;  %v974_v7 = vrot.slane %v184_v49, 4 }
  0xfd   :  { %v312_v8 = vrot.slane %v261_v58, 4  ;;  %v427_v9 = vrot.slane %v261_v58, 2  ;;  %v2325_v10 = vsel %vm316_vm2, %v534_v39, %v261_v58  ;;  %v645_v13 = vrot.slane %v261_v58, 6 }
  0xfe   :  { %v313_v14 = vrot.slane %v263_v2, 4  ;;  %v428_v18 = vrot.slane %v263_v2, 2  ;;  %v2328_v19 = vsel %vm316_vm2, %v535_v43, %v263_v2  ;;  %v646_v20 = vrot.slane %v263_v2, 6 }
  0xff   :  { %v317_v21 = vsel %vm316_vm2, %v178_v27, %v312_v8  ;;  %v2332_v22 = vsel %vm316_vm2, %v423_v35, %v427_v9  ;;  %v2335_v23 = vsel %vm316_vm2, %v641_v40, %v645_v13  ;;  %v2338_v24 = vsel %vm316_vm2, %v186_v60, %v755_v53 }
 0x100   :  { %v318_v25 = vsel %vm316_vm2, %v180_v31, %v313_v14  ;;  %v2342_v26 = vsel %vm316_vm2, %v424_v42, %v428_v18  ;;  %v2345_v28 = vsel %vm316_vm2, %v642_v46, %v646_v20  ;;  %v2348_v29 = vsel %vm316_vm2, %v863_v4, %v867_v54 }
 0x101   :  { %v864_v27 = vrot.slane %v186_v60, 2  ;;  %v2351_v30 = vsel %vm316_vm2, %v974_v7, %v255_v32  ;;  %v975_v33 = vrot.slane %v186_v60, 4  ;;  %v1081_v35 = vrot.slane %v184_v49, 6 }
 0x102   :  { %v1082_v39 = vrot.slane %v186_v60, 6  ;;  %v300_v8 = vand.u32 127, %v71_v16 }
 0x103   :  { %v2354_v40 = vsel %vm316_vm2, %v864_v27, %v868_v55  ;;  %v2357_v31 = vsel %vm316_vm2, %v975_v33, %v257_v34  ;;  %v2360_v41 = vsel %vm316_vm2, %v1081_v35, %v1085_v61 }
 0x104   :  { %v2363_v42 = vsel %vm316_vm2, %v1082_v39, %v1086_v1  ;;  %vm302_vm4 = vcmp.lt.s32.totalorder %v300_v8, 64  ;;  %vm305_vm6 = vcmp.ge.s32.totalorder %v300_v8, 64 }
 0x105   :  { %vm303_vm7 = vmand %vm301_vm3, %vm302_vm4 }
 0x106   :  { %vm306_vm8 = vmand %vm304_vm5, %vm305_vm6 }
 0x107   :  { %vm307_vm9 = vmor %vm303_vm7, %vm306_vm8 }
 0x108   :  { %v2371_v9 = vsel %vm307_vm9, 1.0, %v2043_v0 }
 0x116   :  { %v385_v43 = vpop.f32.mrb[4].mxu0 }
 0x117   :  { %v390_v46 = vadd.f32 %v385_v43, %v317_v21  ;;  %v387_v47 = vpop.f32.mrb[5].mxu0 }
 0x118   :  { %v391_v32 = vadd.f32 %v387_v47, %v318_v25 }
 0x119   :  { %v1421_v48 = vmul.f32 -1.442695, %v390_v46 }
 0x11a   :  { %v1422_v55 = vmul.f32 -1.442695, %v391_v32 }
 0x11b   :  { %1872 = vpow2.f32 %v1421_v48 }
 0x11c   :  { %1874 = vtanh.f32 %v391_v32 }
 0x125   :  { %v1873_v49 = vpop.eup %1872 }
 0x126   :  { %v398_v52 = vadd.f32 1.0, %v1873_v49  ;;  %v1875_v53 = vpop.eup %1874 }
 0x128   :  { %1876 = vrcp.f32 %v398_v52 }
 0x129   :  { %1878 = vpow2.f32 %v1422_v55 }
 0x132   :  { %v1877_v54 = vpop.eup %1876 }
 0x133   :  { %v406_v34 = vmul.f32 %v1877_v54, %v1875_v53  ;;  %v1879_v58 = vpop.eup %1878  ;;  %v405_v60 = vmul.f32 0.0, %v1877_v54 }
 0x134   :  { %v399_v59 = vadd.f32 1.0, %v1879_v58 }
 0x135   :  { %408 = vrot.lane.b32.xlu0 %v406_v34, %s2044_s2 }
 0x136   :  { %1880 = vrcp.f32 %v399_v59 }
 0x140   :  { %v1881_v2 = vpop.eup %1880 }
 0x1a7   :  { %v409_v61 = vpop.permute.xlu0 %408 }
 0x1a8   :  { %v411_v1 = vadd.f32 %v409_v61, %v405_v60 }
 0x1aa   :  { %1882 = vtanh.f32 %v411_v1 }
 0x1b4   :  { %v1883_v4 = vpop.eup %1882 }
 0x1b5   :  { %v413_v7 = vmul.f32 %v1883_v4, %v1881_v2 }
 0x1b7   :  { %415 = vrot.lane.b32.xlu0 %v413_v7, %s2044_s2 }
 0x229   :  { %v416_v13 = vpop.permute.xlu0 %415 }
 0x22a   :  { %v419_v14 = vsel %vm418_vm10, %v416_v13, %v413_v7 }
 0x22b   :  { %v420_v18 = vmul.f32 %v2371_v9, %v419_v14 }
 0x22d   :  { %498 = vmatmul.mubr.f32.vlgmr.msra.gmra.mrb[4].mxu1 %v420_v18 }
 0x22e   :  { %1658 = vmatpush1.bf16.msra.mxu1 %v2138_v37  ;;  %715 = vmatprep.mubr.f32.mxu1 %v2043_v0 }
 0x22f   :  { %1660 = vmatprep.subr.bf16.mxu1 %v2141_v38 }
 0x232   :  { %1662 = vmatpush1.bf16.msra.mxu1 %v2164_v44 }
 0x233   :  { %1664 = vmatprep.subr.bf16.mxu1 %v2167_v45 }
 0x236   :  { %1666 = vmatpush1.bf16.msra.mxu1 %v2187_v50 }
 0x237   :  { %1668 = vmatprep.subr.bf16.mxu1 %v2191_v51 }
 0x23a   :  { %1670 = vmatpush1.bf16.msra.mxu1 %v2208_v56 }
 0x23b   :  { %1672 = vmatprep.subr.bf16.mxu1 %v2212_v57 }
 0x23e   :  { %1674 = vmatpush1.bf16.msra.mxu1 %v2228_v62 }
 0x23f   :  { %1676 = vmatprep.subr.bf16.mxu1 %v2232_v63 }
 0x242   :  { %1678 = vmatpush1.bf16.msra.mxu1 %v2248_v5 }
 0x243   :  { %1680 = vmatprep.subr.bf16.mxu1 %v2252_v6 }
 0x246   :  { %1682 = vmatpush1.bf16.msra.mxu1 %v2268_v11 }
 0x247   :  { %1684 = vmatprep.subr.bf16.mxu1 %v2272_v12 }
 0x24a   :  { %1686 = vmatpush1.bf16.msra.mxu1 %v2282_v15 }
 0x24b   :  { %1720 = vmatprep.subr.bf16.mxu1 %v2136_v36 }
 0x300   :  { %v499_v16 = vpop.f32.mrb[4].mxu1 }
 0x301   :  { %v504_v17 = vadd.f32 %v499_v16, %v2332_v22  ;;  %v501_v20 = vpop.f32.mrb[5].mxu1 }
 0x302   :  { %v505_v21 = vadd.f32 %v501_v20, %v2342_v26 }
 0x303   :  { %v1423_v25 = vmul.f32 -1.442695, %v504_v17 }
 0x304   :  { %v1424_v46 = vmul.f32 -1.442695, %v505_v21 }
 0x305   :  { %1884 = vpow2.f32 %v1423_v25 }
 0x306   :  { %1886 = vtanh.f32 %v505_v21 }
 0x30f   :  { %v1885_v27 = vpop.eup %1884 }
 0x310   :  { %v512_v33 = vadd.f32 1.0, %v1885_v27  ;;  %v1887_v35 = vpop.eup %1886 }
 0x312   :  { %1888 = vrcp.f32 %v512_v33 }
 0x313   :  { %1890 = vpow2.f32 %v1424_v46 }
 0x31c   :  { %v1889_v39 = vpop.eup %1888 }
 0x31d   :  { %v520_v43 = vmul.f32 %v1889_v39, %v1887_v35  ;;  %v1891_v47 = vpop.eup %1890  ;;  %v519_v48 = vmul.f32 %v1889_v39, %v411_v1 }
 0x31e   :  { %v513_v32 = vadd.f32 1.0, %v1891_v47 }
 0x31f   :  { %522 = vrot.lane.b32.xlu1 %v520_v43, %s2044_s2 }
 0x320   :  { %1892 = vrcp.f32 %v513_v32 }
 0x32a   :  { %v1893_v26 = vpop.eup %1892 }
 0x391   :  { %v523_v22 = vpop.permute.xlu1 %522 }
 0x392   :  { %v525_v49 = vadd.f32 %v523_v22, %v519_v48 }
 0x394   :  { %1894 = vtanh.f32 %v525_v49 }
 0x39e   :  { %v1895_v52 = vpop.eup %1894 }
 0x39f   :  { %v527_v53 = vmul.f32 %v1895_v52, %v1893_v26 }
 0x3a1   :  { %529 = vrot.lane.b32.xlu1 %v527_v53, %s2044_s2 }
 0x413   :  { %v530_v54 = vpop.permute.xlu1 %529 }
 0x414   :  { %v532_v34 = vsel %vm418_vm10, %v530_v54, %v527_v53 }
 0x415   :  { %v533_v55 = vmul.f32 %v2371_v9, %v532_v34 }
 0x417   :  { %605 = vmatmul.mubr.f32.vlgmr.msra.gmra.mrb[6].mxu0 %v533_v55 }
 0x418   :  { %1690 = vmatpush1.bf16.msra.mxu0 %v2138_v37  ;;  %824 = vmatprep.mubr.f32.mxu0 %v2043_v0 }
 0x419   :  { %1692 = vmatprep.subr.bf16.mxu0 %v2141_v38 }
 0x41c   :  { %1694 = vmatpush1.bf16.msra.mxu0 %v2164_v44 }
 0x41d   :  { %1696 = vmatprep.subr.bf16.mxu0 %v2167_v45 }
 0x420   :  { %1698 = vmatpush1.bf16.msra.mxu0 %v2187_v50 }
 0x421   :  { %1700 = vmatprep.subr.bf16.mxu0 %v2191_v51 }
 0x424   :  { %1702 = vmatpush1.bf16.msra.mxu0 %v2208_v56 }
 0x425   :  { %1704 = vmatprep.subr.bf16.mxu0 %v2212_v57 }
 0x428   :  { %1706 = vmatpush1.bf16.msra.mxu0 %v2228_v62 }
 0x429   :  { %1708 = vmatprep.subr.bf16.mxu0 %v2232_v63 }
 0x42c   :  { %1710 = vmatpush1.bf16.msra.mxu0 %v2248_v5 }
 0x42d   :  { %1712 = vmatprep.subr.bf16.mxu0 %v2252_v6 }
 0x430   :  { %1714 = vmatpush1.bf16.msra.mxu0 %v2268_v11 }
 0x431   :  { %1716 = vmatprep.subr.bf16.mxu0 %v2272_v12 }
 0x434   :  { %1718 = vmatpush1.bf16.msra.mxu0 %v2282_v15 }
 0x435   :  { %1752 = vmatprep.subr.bf16.mxu0 %v2136_v36 }
 0x4ea   :  { %v606_v58 = vpop.f32.mrb[6].mxu0 }
 0x4eb   :  { %v611_v59 = vadd.f32 %v606_v58, %v2325_v10  ;;  %v608_v60 = vpop.f32.mrb[7].mxu0 }
 0x4ec   :  { %v612_v61 = vadd.f32 %v608_v60, %v2328_v19 }
 0x4ed   :  { %v1425_v1 = vmul.f32 -1.442695, %v611_v59 }
 0x4ee   :  { %v1426_v14 = vmul.f32 -1.442695, %v612_v61 }
 0x4ef   :  { %1896 = vpow2.f32 %v1425_v1 }
 0x4f0   :  { %1898 = vtanh.f32 %v612_v61 }
 0x4f9   :  { %v1897_v2 = vpop.eup %1896 }
 0x4fa   :  { %v619_v4 = vadd.f32 1.0, %v1897_v2  ;;  %v1899_v7 = vpop.eup %1898 }
 0x4fc   :  { %1900 = vrcp.f32 %v619_v4 }
 0x4fd   :  { %1902 = vpow2.f32 %v1426_v14 }
 0x506   :  { %v1901_v8 = vpop.eup %1900 }
 0x507   :  { %v627_v13 = vmul.f32 %v1901_v8, %v1899_v7  ;;  %v1903_v18 = vpop.eup %1902  ;;  %v626_v17 = vmul.f32 %v1901_v8, %v525_v49 }
 0x508   :  { %v620_v16 = vadd.f32 1.0, %v1903_v18 }
 0x509   :  { %629 = vrot.lane.b32.xlu0 %v627_v13, %s2044_s2 }
 0x50a   :  { %1904 = vrcp.f32 %v620_v16 }
 0x514   :  { %v1905_v19 = vpop.eup %1904 }
 0x57b   :  { %v630_v10 = vpop.permute.xlu0 %629 }
 0x57c   :  { %v632_v20 = vadd.f32 %v630_v10, %v626_v17 }
 0x57e   :  { %1906 = vtanh.f32 %v632_v20 }
 0x588   :  { %v1907_v21 = vpop.eup %1906 }
 0x589   :  { %v634_v25 = vmul.f32 %v1907_v21, %v1905_v19 }
 0x58b   :  { %636 = vrot.lane.b32.xlu1 %v634_v25, %s2044_s2 }
 0x5fd   :  { %v637_v27 = vpop.permute.xlu1 %636 }
 0x5fe   :  { %v639_v33 = vsel %vm418_vm10, %v637_v27, %v634_v25 }
 0x5ff   :  { %v640_v35 = vmul.f32 %v2371_v9, %v639_v33 }
 0x601   :  { %716 = vmatmul.mubr.f32.vlgmr.msra.gmra.mrb[6].mxu1 %v640_v35 }
 0x602   :  { %1722 = vmatpush1.bf16.msra.mxu1 %v2138_v37  ;;  %937 = vmatprep.mubr.f32.mxu1 %v2043_v0 }
 0x603   :  { %1724 = vmatprep.subr.bf16.mxu1 %v2141_v38 }
 0x606   :  { %1726 = vmatpush1.bf16.msra.mxu1 %v2164_v44 }
 0x607   :  { %1728 = vmatprep.subr.bf16.mxu1 %v2167_v45 }
 0x60a   :  { %1730 = vmatpush1.bf16.msra.mxu1 %v2187_v50 }
 0x60b   :  { %1732 = vmatprep.subr.bf16.mxu1 %v2191_v51 }
 0x60e   :  { %1734 = vmatpush1.bf16.msra.mxu1 %v2208_v56 }
 0x60f   :  { %1736 = vmatprep.subr.bf16.mxu1 %v2212_v57 }
 0x612   :  { %1738 = vmatpush1.bf16.msra.mxu1 %v2228_v62 }
 0x613   :  { %1740 = vmatprep.subr.bf16.mxu1 %v2232_v63 }
 0x616   :  { %1742 = vmatpush1.bf16.msra.mxu1 %v2248_v5 }
 0x617   :  { %1744 = vmatprep.subr.bf16.mxu1 %v2252_v6 }
 0x61a   :  { %1746 = vmatpush1.bf16.msra.mxu1 %v2268_v11 }
 0x61b   :  { %1748 = vmatprep.subr.bf16.mxu1 %v2272_v12 }
 0x61e   :  { %1750 = vmatpush1.bf16.msra.mxu1 %v2282_v15 }
 0x61f   :  { %1784 = vmatprep.subr.bf16.mxu1 %v2136_v36 }
 0x6d4   :  { %v717_v39 = vpop.f32.mrb[6].mxu1 }
 0x6d5   :  { %v722_v43 = vadd.f32 %v717_v39, %v2335_v23  ;;  %v719_v46 = vpop.f32.mrb[7].mxu1 }
 0x6d6   :  { %v723_v47 = vadd.f32 %v719_v46, %v2345_v28 }
 0x6d7   :  { %v1427_v32 = vmul.f32 -1.442695, %v722_v43 }
 0x6d8   :  { %v1428_v53 = vmul.f32 -1.442695, %v723_v47 }
 0x6d9   :  { %1908 = vpow2.f32 %v1427_v32 }
 0x6da   :  { %1910 = vtanh.f32 %v723_v47 }
 0x6e3   :  { %v1909_v48 = vpop.eup %1908 }
 0x6e4   :  { %v730_v22 = vadd.f32 1.0, %v1909_v48  ;;  %v1911_v49 = vpop.eup %1910 }
 0x6e6   :  { %1912 = vrcp.f32 %v730_v22 }
 0x6e7   :  { %1914 = vpow2.f32 %v1428_v53 }
 0x6f0   :  { %v1913_v26 = vpop.eup %1912 }
 0x6f1   :  { %v738_v52 = vmul.f32 %v1913_v26, %v1911_v49  ;;  %v1915_v36 = vpop.eup %1914  ;;  %v737_v34 = vmul.f32 %v1913_v26, %v632_v20 }
 0x6f2   :  { %v731_v54 = vadd.f32 1.0, %v1915_v36 }
 0x6f3   :  { %740 = vrot.lane.b32.xlu0 %v738_v52, %s2044_s2 }
 0x6f4   :  { %1916 = vrcp.f32 %v731_v54 }
 0x6fe   :  { %v1917_v28 = vpop.eup %1916 }
 0x765   :  { %v741_v23 = vpop.permute.xlu0 %740 }
 0x766   :  { %v743_v55 = vadd.f32 %v741_v23, %v737_v34 }
 0x768   :  { %1918 = vtanh.f32 %v743_v55 }
 0x772   :  { %v1919_v58 = vpop.eup %1918 }
 0x773   :  { %v745_v59 = vmul.f32 %v1919_v58, %v1917_v28 }
 0x775   :  { %747 = vrot.lane.b32.xlu1 %v745_v59, %s2044_s2 }
 0x7e7   :  { %v748_v60 = vpop.permute.xlu1 %747 }
 0x7e8   :  { %v750_v61 = vsel %vm418_vm10, %v748_v60, %v745_v59 }
 0x7e9   :  { %v751_v1 = vmul.f32 %v2371_v9, %v750_v61 }
 0x7eb   :  { %825 = vmatmul.mubr.f32.vlgmr.msra.gmra.mrb[8].mxu0 %v751_v1 }
 0x7ec   :  { %1754 = vmatpush1.bf16.msra.mxu0 %v2138_v37  ;;  %1044 = vmatprep.mubr.f32.mxu0 %v2043_v0 }
 0x7ed   :  { %1756 = vmatprep.subr.bf16.mxu0 %v2141_v38 }
 0x7f0   :  { %1758 = vmatpush1.bf16.msra.mxu0 %v2164_v44 }
 0x7f1   :  { %1760 = vmatprep.subr.bf16.mxu0 %v2167_v45 }
 0x7f4   :  { %1762 = vmatpush1.bf16.msra.mxu0 %v2187_v50 }
 0x7f5   :  { %1764 = vmatprep.subr.bf16.mxu0 %v2191_v51 }
 0x7f8   :  { %1766 = vmatpush1.bf16.msra.mxu0 %v2208_v56 }
 0x7f9   :  { %1768 = vmatprep.subr.bf16.mxu0 %v2212_v57 }
 0x7fc   :  { %1770 = vmatpush1.bf16.msra.mxu0 %v2228_v62 }
 0x7fd   :  { %1772 = vmatprep.subr.bf16.mxu0 %v2232_v63 }
 0x800   :  { %1774 = vmatpush1.bf16.msra.mxu0 %v2248_v5 }
 0x801   :  { %1776 = vmatprep.subr.bf16.mxu0 %v2252_v6 }
 0x804   :  { %1778 = vmatpush1.bf16.msra.mxu0 %v2268_v11 }
 0x805   :  { %1780 = vmatprep.subr.bf16.mxu0 %v2272_v12 }
 0x808   :  { %1782 = vmatpush1.bf16.msra.mxu0 %v2282_v15 }
 0x8be   :  { %v826_v2 = vpop.f32.mrb[8].mxu0 }
 0x8bf   :  { %v831_v4 = vadd.f32 %v826_v2, %v2322_v3  ;;  %v828_v7 = vpop.f32.mrb[9].mxu0 }
 0x8c0   :  { %v832_v8 = vadd.f32 %v828_v7, %v2338_v24 }
 0x8c1   :  { %v1429_v13 = vmul.f32 -1.442695, %v831_v4 }
 0x8c2   :  { %v1430_v20 = vmul.f32 -1.442695, %v832_v8 }
 0x8c3   :  { %1920 = vpow2.f32 %v1429_v13 }
 0x8c4   :  { %1922 = vtanh.f32 %v832_v8 }
 0x8cd   :  { %v1921_v14 = vpop.eup %1920 }
 0x8ce   :  { %v839_v18 = vadd.f32 1.0, %v1921_v14  ;;  %v1923_v16 = vpop.eup %1922 }
 0x8d0   :  { %1924 = vrcp.f32 %v839_v18 }
 0x8d1   :  { %1926 = vpow2.f32 %v1430_v20 }
 0x8da   :  { %v1925_v17 = vpop.eup %1924 }
 0x8db   :  { %v847_v10 = vmul.f32 %v1925_v17, %v1923_v16  ;;  %v1927_v19 = vpop.eup %1926  ;;  %v846_v25 = vmul.f32 %v1925_v17, %v743_v55 }
 0x8dc   :  { %v840_v21 = vadd.f32 1.0, %v1927_v19 }
 0x8dd   :  { %849 = vrot.lane.b32.xlu0 %v847_v10, %s2044_s2 }
 0x8de   :  { %1928 = vrcp.f32 %v840_v21 }
 0x8e8   :  { %v1929_v24 = vpop.eup %1928 }
 0x94f   :  { %v850_v3 = vpop.permute.xlu0 %849 }
 0x950   :  { %v852_v27 = vadd.f32 %v850_v3, %v846_v25 }
 0x952   :  { %1930 = vtanh.f32 %v852_v27 }
 0x95c   :  { %v1931_v33 = vpop.eup %1930 }
 0x95d   :  { %v854_v35 = vmul.f32 %v1931_v33, %v1929_v24  ;;  %v2045_v24 = vmov 0.0|0.0  }
 0x95e   :  { %1815 = vmatprep.subr.bf16.mxu0 %v2045_v24 }
 0x95f   :  { %856 = vrot.lane.b32.xlu1 %v854_v35, %s2044_s2 }
 0x9d1   :  { %v857_v39 = vpop.permute.xlu1 %856 }
 0x9d2   :  { %v859_v43 = vsel %vm418_vm10, %v857_v39, %v854_v35  ;;  %v1287_v35 = vld [vmem:[%s2661_s6 + $0x8] sm:$0xff]  ;;  %v1195_v39 = vld [vmem:[%s2659_s4 + $0x10] sm:$0xff] }
 0x9d3   :  { %v860_v46 = vmul.f32 %v2371_v9, %v859_v43  ;;  %v1196_v43 = vld [vmem:[%s2659_s4 + $0x18] sm:$0xff] }
 0x9d5   :  { %938 = vmatmul.mubr.f32.vlgmr.msra.gmra.mrb[8].mxu1 %v860_v46 }
 0x9d6   :  { %1786 = vmatpush1.bf16.msra.mxu1 %v2138_v37  ;;  %1155 = vmatprep.mubr.f32.mxu1 %v2043_v0 }
 0x9d7   :  { %1788 = vmatprep.subr.bf16.mxu1 %v2141_v38 }
 0x9da   :  { %1790 = vmatpush1.bf16.msra.mxu1 %v2164_v44 }
 0x9db   :  { %1792 = vmatprep.subr.bf16.mxu1 %v2167_v45 }
 0x9de   :  { %1794 = vmatpush1.bf16.msra.mxu1 %v2187_v50 }
 0x9df   :  { %1796 = vmatprep.subr.bf16.mxu1 %v2191_v51 }
 0x9e2   :  { %1798 = vmatpush1.bf16.msra.mxu1 %v2208_v56 }
 0x9e3   :  { %1800 = vmatprep.subr.bf16.mxu1 %v2212_v57 }
 0x9e6   :  { %1802 = vmatpush1.bf16.msra.mxu1 %v2228_v62 }
 0x9e7   :  { %1804 = vmatprep.subr.bf16.mxu1 %v2232_v63 }
 0x9ea   :  { %1806 = vmatpush1.bf16.msra.mxu1 %v2248_v5 }
 0x9eb   :  { %1808 = vmatprep.subr.bf16.mxu1 %v2252_v6 }
 0x9ee   :  { %1810 = vmatpush1.bf16.msra.mxu1 %v2268_v11 }
 0x9ef   :  { %1812 = vmatprep.subr.bf16.mxu1 %v2272_v12 }
 0x9f2   :  { %1814 = vmatpush1.bf16.msra.mxu1 %v2282_v15 }
 0x9f3   :  { %1839 = vmatprep.subr.bf16.mxu1 %v2045_v24 }
 0xaa8   :  { %v939_v37 = vpop.f32.mrb[8].mxu1 }
 0xaa9   :  { %v944_v38 = vadd.f32 %v939_v37, %v2348_v29  ;;  %v941_v44 = vpop.f32.mrb[9].mxu1  ;;  %v1288_v37 = vld [vmem:[%s2661_s6 + $0x10] sm:$0xff] }
 0xaaa   :  { %v945_v45 = vadd.f32 %v941_v44, %v2354_v40  ;;  %v1819_v44 = vpack.c.bf16 %v1196_v43, %v1195_v39 }
 0xaab   :  { %v1431_v50 = vmul.f32 -1.442695, %v944_v38  ;;  %v1289_v38 = vld [vmem:[%s2661_s6 + $0x18] sm:$0xff] }
 0xaac   :  { %v1432_v5 = vmul.f32 -1.442695, %v945_v45 }
 0xaad   :  { %1932 = vpow2.f32 %v1431_v50  ;;  %v1197_v50 = vld [vmem:[%s2659_s4 + $0x20] sm:$0xff] }
 0xaae   :  { %1934 = vtanh.f32 %v945_v45  ;;  %v1843_v45 = vpack.c.bf16 %v1289_v38, %v1288_v37 }
 0xab7   :  { %v1933_v51 = vpop.eup %1932 }
 0xab8   :  { %v952_v56 = vadd.f32 1.0, %v1933_v51  ;;  %v1935_v57 = vpop.eup %1934  ;;  %v1198_v51 = vld [vmem:[%s2659_s4 + $0x28] sm:$0xff] }
 0xaba   :  { %1936 = vrcp.f32 %v952_v56  ;;  %v1290_v56 = vld [vmem:[%s2661_s6 + $0x20] sm:$0xff] }
 0xabb   :  { %1938 = vpow2.f32 %v1432_v5  ;;  %v1199_v5 = vld [vmem:[%s2659_s4 + $0x30] sm:$0xff] }
 0xac4   :  { %v1937_v62 = vpop.eup %1936 }
 0xac5   :  { %v960_v63 = vmul.f32 %v1937_v62, %v1935_v57  ;;  %v1939_v6 = vpop.eup %1938  ;;  %v959_v12 = vmul.f32 %v1937_v62, %v852_v27  ;;  %v1286_v27 = vld [vmem:[%s2661_s6] sm:$0xff]  ;;  %v1291_v57 = vld [vmem:[%s2661_s6 + $0x28] sm:$0xff]  ;;  %v1822_v62 = vpack.c.bf16 %v1198_v51, %v1197_v50 }
 0xac6   :  { %v953_v11 = vadd.f32 1.0, %v1939_v6  ;;  %v1840_v46 = vpack.c.bf16 %v1287_v35, %v1286_v27  ;;  %v1200_v6 = vld [vmem:[%s2659_s4 + $0x38] sm:$0xff] }
 0xac7   :  { %962 = vrot.lane.b32.xlu0 %v960_v63, %s2044_s2  ;;  %v1846_v63 = vpack.c.bf16 %v1291_v57, %v1290_v56 }
 0xac8   :  { %1940 = vrcp.f32 %v953_v11  ;;  %v1292_v11 = vld [vmem:[%s2661_s6 + $0x30] sm:$0xff] }
 0xad2   :  { %v1941_v40 = vpop.eup %1940 }
 0xb39   :  { %v963_v15 = vpop.permute.xlu0 %962 }
 0xb3a   :  { %v965_v29 = vadd.f32 %v963_v15, %v959_v12  ;;  %v1293_v12 = vld [vmem:[%s2661_s6 + $0x38] sm:$0xff]  ;;  %v1825_v15 = vpack.c.bf16 %v1200_v6, %v1199_v5 }
 0xb3c   :  { %1942 = vtanh.f32 %v965_v29 }
 0xb46   :  { %v1943_v47 = vpop.eup %1942 }
 0xb47   :  { %v967_v32 = vmul.f32 %v1943_v47, %v1941_v40  ;;  %v1201_v40 = vld [vmem:[%s2659_s4 + $0x40] sm:$0xff]  ;;  %v1202_v47 = vld [vmem:[%s2659_s4 + $0x48] sm:$0xff] }
 0xb49   :  { %969 = vrot.lane.b32.xlu1 %v967_v32, %s2044_s2 }
 0xbbb   :  { %v970_v48 = vpop.permute.xlu1 %969 }
 0xbbc   :  { %v972_v22 = vsel %vm418_vm10, %v970_v48, %v967_v32  ;;  %v1294_v32 = vld [vmem:[%s2661_s6 + $0x40] sm:$0xff]  ;;  %v1295_v48 = vld [vmem:[%s2661_s6 + $0x48] sm:$0xff] }
 0xbbd   :  { %v973_v49 = vmul.f32 %v2371_v9, %v972_v22  ;;  %v1828_v22 = vpack.c.bf16 %v1202_v47, %v1201_v40 }
 0xbbf   :  { %1045 = vmatmul.mubr.f32.vlgmr.msra.gmra.mrb[10].mxu0 %v973_v49  ;;  %v1852_v49 = vpack.c.bf16 %v1295_v48, %v1294_v32 }
 0xbc0   :  { %1505 = vmatprep.mubr.msk.f32.mxu0 %vm2046_vm11, %v2043_v0 }
 0xc92   :  { %v1046_v26 = vpop.f32.mrb[10].mxu0 }
 0xc93   :  { %v1051_v52 = vadd.f32 %v1046_v26, %v2351_v30  ;;  %v1048_v53 = vpop.f32.mrb[11].mxu0  ;;  %v1203_v26 = vld [vmem:[%s2659_s4 + $0x50] sm:$0xff] }
 0xc94   :  { %v1052_v36 = vadd.f32 %v1048_v53, %v2357_v31  ;;  %v1296_v53 = vld [vmem:[%s2661_s6 + $0x50] sm:$0xff] }
 0xc95   :  { %v1433_v54 = vmul.f32 -1.442695, %v1051_v52  ;;  %v1204_v52 = vld [vmem:[%s2659_s4 + $0x58] sm:$0xff] }
 0xc96   :  { %v1434_v59 = vmul.f32 -1.442695, %v1052_v36 }
 0xc97   :  { %1944 = vpow2.f32 %v1433_v54  ;;  %v1831_v54 = vpack.c.bf16 %v1204_v52, %v1203_v26 }
 0xc98   :  { %1946 = vtanh.f32 %v1052_v36  ;;  %v1297_v36 = vld [vmem:[%s2661_s6 + $0x58] sm:$0xff] }
 0xca1   :  { %v1945_v34 = vpop.eup %1944 }
 0xca2   :  { %v1059_v23 = vadd.f32 1.0, %v1945_v34  ;;  %v1947_v55 = vpop.eup %1946  ;;  %v1855_v34 = vpack.c.bf16 %v1297_v36, %v1296_v53 }
 0xca4   :  { %1948 = vrcp.f32 %v1059_v23  ;;  %v1205_v23 = vld [vmem:[%s2659_s4 + $0x60] sm:$0xff] }
 0xca5   :  { %1950 = vpow2.f32 %v1434_v59 }
 0xcae   :  { %v1949_v28 = vpop.eup %1948 }
 0xcaf   :  { %v1067_v58 = vmul.f32 %v1949_v28, %v1947_v55  ;;  %v1951_v60 = vpop.eup %1950  ;;  %v1066_v1 = vmul.f32 %v1949_v28, %v965_v29  ;;  %v1849_v29 = vpack.c.bf16 %v1293_v12, %v1292_v11  ;;  %v1206_v55 = vld [vmem:[%s2659_s4 + $0x68] sm:$0xff]  ;;  %v1298_v28 = vld [vmem:[%s2661_s6 + $0x60] sm:$0xff] }
 0xcb0   :  { %v1060_v61 = vadd.f32 1.0, %v1951_v60  ;;  %v1834_v59 = vpack.c.bf16 %v1206_v55, %v1205_v23 }
 0xcb1   :  { %1069 = vrot.lane.b32.xlu0 %v1067_v58, %s2044_s2  ;;  %v1299_v58 = vld [vmem:[%s2661_s6 + $0x68] sm:$0xff] }
 0xcb2   :  { %1952 = vrcp.f32 %v1060_v61  ;;  %v1858_v60 = vpack.c.bf16 %v1299_v58, %v1298_v28  ;;  %v1207_v61 = vld [vmem:[%s2659_s4 + $0x70] sm:$0xff] }
 0xcbc   :  { %v1953_v31 = vpop.eup %1952 }
 0xd23   :  { %v1070_v30 = vpop.permute.xlu0 %1069 }
 0xd24   :  { %v2491_v2 = vadd.f32 %v1070_v30, %v1066_v1  ;;  %v1208_v1 = vld [vmem:[%s2659_s4 + $0x78] sm:$0xff]  ;;  %v1300_v30 = vld [vmem:[%s2661_s6 + $0x70] sm:$0xff] }
 0xd26   :  { %1954 = vtanh.f32 %v2491_v2 }
 0xd30   :  { %v1955_v4 = vpop.eup %1954 }
 0xd31   :  { %v1074_v7 = vmul.f32 %v1955_v4, %v1953_v31  ;;  %v1301_v31 = vld [vmem:[%s2661_s6 + $0x78] sm:$0xff]  ;;  %v1837_v4 = vpack.c.bf16 %v1208_v1, %v1207_v61 }
 0xd33   :  { %1076 = vrot.lane.b32.xlu1 %v1074_v7, %s2044_s2 }
 0xda5   :  { %v1077_v8 = vpop.permute.xlu1 %1076 }
 0xda6   :  { %v1079_v13 = vsel %vm418_vm10, %v1077_v8, %v1074_v7  ;;  %v1861_v7 = vpack.c.bf16 %v1301_v31, %v1300_v30 }
 0xda7   :  { %v1080_v14 = vmul.f32 %v2371_v9, %v1079_v13 }
 0xda9   :  { %1156 = vmatmul.mubr.f32.vlgmr.msra.gmra.mrb[10].mxu1 %v1080_v14 }
 0xdaa   :  { %1841 = vmatpush3.bf16.msra.mxu1 %v1840_v46  ;;  %1540 = vmatprep.mubr.msk.f32.mxu1 %vm2046_vm11, %v2043_v0 }
 0xdab   :  { %1842 = vmatprep.subr.bf16.mxu1 %v2045_v24 }
 0xdae   :  { %1844 = vmatpush3.bf16.msra.mxu1 %v1843_v45 }
 0xdaf   :  { %1845 = vmatprep.subr.bf16.mxu1 %v2045_v24 }
 0xdb2   :  { %1847 = vmatpush3.bf16.msra.mxu1 %v1846_v63 }
 0xdb3   :  { %1848 = vmatprep.subr.bf16.mxu1 %v2045_v24 }
 0xdb6   :  { %1850 = vmatpush3.bf16.msra.mxu1 %v1849_v29 }
 0xdb7   :  { %1851 = vmatprep.subr.bf16.mxu1 %v2045_v24 }
 0xdba   :  { %1853 = vmatpush3.bf16.msra.mxu1 %v1852_v49 }
 0xdbb   :  { %1854 = vmatprep.subr.bf16.mxu1 %v2045_v24 }
 0xdbe   :  { %1856 = vmatpush3.bf16.msra.mxu1 %v1855_v34 }
 0xdbf   :  { %1857 = vmatprep.subr.bf16.mxu1 %v2045_v24 }
 0xdc2   :  { %1859 = vmatpush3.bf16.msra.mxu1 %v1858_v60 }
 0xdc3   :  { %1860 = vmatprep.subr.bf16.mxu1 %v2045_v24 }
 0xdc6   :  { %1862 = vmatpush3.bf16.msra.mxu1 %v1861_v7 }
 0xe7c   :  { %v1157_v18 = vpop.f32.mrb[10].mxu1 }
 0xe7d   :  { %v1162_v16 = vadd.f32 %v1157_v18, %v2360_v41  ;;  %v1159_v17 = vpop.f32.mrb[11].mxu1  ;;  %v1193_v41 = vld [vmem:[%s2659_s4] sm:$0xff] }
 0xe7e   :  { %v2499_v10 = vadd.f32 %v1159_v17, %v2363_v42  ;;  %v1194_v42 = vld [vmem:[%s2659_s4 + $0x8] sm:$0xff] }
 0xe7f   :  { %v1435_v20 = vmul.f32 -1.442695, %v1162_v16  ;;  %v1816_v33 = vpack.c.bf16 %v1194_v42, %v1193_v41 }
 0xe80   :  { %v1436_v8 = vmul.f32 -1.442695, %v2499_v10 }
 0xe81   :  { %1956 = vpow2.f32 %v1435_v20  ;;  %1817 = vmatpush3.bf16.msra.mxu0 %v1816_v33 }
 0xe82   :  { %1958 = vtanh.f32 %v2499_v10  ;;  %1818 = vmatprep.subr.bf16.mxu0 %v2045_v24 }
 0xe85   :  { %1820 = vmatpush3.bf16.msra.mxu0 %v1819_v44 }
 0xe86   :  { %1821 = vmatprep.subr.bf16.mxu0 %v2045_v24 }
 0xe89   :  { %1823 = vmatpush3.bf16.msra.mxu0 %v1822_v62 }
 0xe8a   :  { %1824 = vmatprep.subr.bf16.mxu0 %v2045_v24 }
 0xe8b   :  { %v1957_v19 = vpop.eup %1956 }
 0xe8c   :  { %v1170_v21 = vadd.f32 1.0, %v1957_v19  ;;  %v1959_v25 = vpop.eup %1958 }
 0xe8d   :  { %1826 = vmatpush3.bf16.msra.mxu0 %v1825_v15 }
 0xe8e   :  { %1960 = vrcp.f32 %v1170_v21  ;;  %1827 = vmatprep.subr.bf16.mxu0 %v2045_v24 }
 0xe8f   :  { %1962 = vpow2.f32 %v1436_v8 }
 0xe91   :  { %1829 = vmatpush3.bf16.msra.mxu0 %v1828_v22 }
 0xe92   :  { %1830 = vmatprep.subr.bf16.mxu0 %v2045_v24 }
 0xe95   :  { %1832 = vmatpush3.bf16.msra.mxu0 %v1831_v54 }
 0xe96   :  { %1833 = vmatprep.subr.bf16.mxu0 %v2045_v24 }
 0xe98   :  { %v2502_v3 = vpop.eup %1960 }
 0xe99   :  { %v1178_v9 = vmul.f32 %v2502_v3, %v1959_v25  ;;  %1835 = vmatpush3.bf16.msra.mxu0 %v1834_v59  ;;  %v1963_v13 = vpop.eup %1962  ;;  %v1177_v18 = vmul.f32 %v2502_v3, %v2491_v2  ;;  %v1437_v2 = vld [vmem:[%s2660_s5] ss:$0 sm:$0xff]  ;;  %s1990_s5 = scalar_lea.vmem %s1390_s20, 32 }
 0xe9a   :  { %1836 = vmatprep.subr.bf16.mxu0 %v2045_v24  ;;  %v1171_v14 = vadd.f32 1.0, %v1963_v13  ;;  %v1438_v3 = vld [vmem:[%s2662_s7] ss:$0 sm:$0xff]  ;;  %p1991_p8 = scmp.ne.s32.totalorder %s1390_s20, %s1990_s5  ;;  %p1996_p10 = scmp.lt.s32.totalorder %s1990_s5, %s1990_s5 }
 0xe9b   :  { %1180 = vrot.lane.b32.xlu0 %v1178_v9, %s2044_s2 }
 0xe9c   :  { %1964 = vrcp.f32 %v1171_v14  ;;  %p1997_p11 = por %p1996_p10, %p1995_p9 }
 0xe9d   :  { %1838 = vmatpush3.bf16.msra.mxu0 %v1837_v4 }
 0xe9e   :  { %p1998_p12 = pnand %p1997_p11, %p1991_p8 }
 0xea6   :  { %v1965_v20 = vpop.eup %1964 }
 0xf0d   :  { %v1181_v16 = vpop.permute.xlu0 %1180 }
 0xf0e   :  { %v1183_v17 = vadd.f32 %v1181_v16, %v1177_v18 }
 0xf10   :  { %1966 = vtanh.f32 %v1183_v17 }
 0xf1a   :  { %v1967_v19 = vpop.eup %1966 }
 0xf1b   :  { %v1185_v21 = vmul.f32 %v1967_v19, %v1965_v20 }
 0xf1d   :  { %1187 = vrot.lane.b32.xlu1 %v1185_v21, %s2044_s2  ;;  %v1190_v10 = vrot.slane %v1185_v21, 2 }
 0xf8f   :  { %v1188_v25 = vpop.permute.xlu1 %1187 }
 0xf90   :  { %v1192_v9 = vsel %vm418_vm10, %v1188_v25, %v1190_v10 }
 0xf91   :  { %1506 = vmatmul.mubr.f32.vlgmr.msra.gmra.mrb[12].mxu0 %v1192_v9  ;;  %1541 = vmatmul.mubr.f32.vlgmr.msra.gmra.mrb[12].mxu1 %v1192_v9 }
0x1064   :  { %v1282_v0 = vpop.f32.mrb[12].mxu0  ;;  %v1375_v41 = vpop.f32.mrb[12].mxu1 }
0x1065   :  { %v1283_v42 = vadd.f32 %v1437_v2, %v1282_v0  ;;  %v1376_v27 = vadd.f32 %v1438_v3, %v1375_v41  ;;  %v1507_v24 = vpop.f32.mrb[13].mxu0  ;;  %v1542_v33 = vpop.f32.mrb[13].mxu1 }
0x1067   :  { %1380 = vst.msk [vmem:[#allocation5] sm:$0x3] %vm1379_vm12, %v1283_v42 }
0x1068   :  { %1382 = vst.msk [vmem:[#allocation6] sm:$0x3] %vm1381_vm13, %v1376_v27 }
0x1069   :  { %2001 = shalt.err (!%p1998_p12)
}
0x106a   :  { %s2002_s3 = scalar_lea.hbm %s2663_s8, 32 }
0x106b   :  { %p2003_p13 = scmp.ne.s32.totalorder %s2663_s8, %s2002_s3  ;;  %p2006_p0 = scmp.lt.u32.totalorder %s2002_s3, %s2663_s8 }
0x106d   :  { %p2008_p1 = pnand %p2006_p0, %p2003_p13 }
0x106f   :  { %2011 = shalt.err (!%p2008_p1)
}
0x1070   :  { %1392 = dma.vmem_to_hbm [thread:$0]  %s1390_s20, 32, %s2663_s8, [#allocation4]  }
0x1071   :  { %s2012_s28 = scalar_lea.vmem %s1400_s22, 32  ;;  %p2017_p3 = scmp.lt.s32.totalorder %s1400_s22, %s1400_s22 }
0x1072   :  { %p2013_p2 = scmp.ne.s32.totalorder %s1400_s22, %s2012_s28  ;;  %p2018_p4 = scmp.lt.s32.totalorder %s2012_s28, %s2012_s28 }
0x1074   :  { %p2019_p5 = por %p2018_p4, %p2017_p3 }
0x1076   :  { %p2020_p6 = pnand %p2019_p5, %p2013_p2 }
0x1078   :  { %2023 = shalt.err (!%p2020_p6)
}
0x1079   :  { %s2024_s30 = scalar_lea.hbm %s2664_s9, 32 }
0x107a   :  { %p2025_p7 = scmp.ne.s32.totalorder %s2664_s9, %s2024_s30  ;;  %p2028_p8 = scmp.lt.u32.totalorder %s2024_s30, %s2664_s9 }
0x107c   :  { %p2030_p9 = pnand %p2028_p8, %p2025_p7 }
0x107e   :  { %2033 = shalt.err (!%p2030_p9)
}
0x107f   :  { %1402 = dma.vmem_to_hbm [thread:$0]  %s1400_s22, 32, %s2664_s9, [#allocation7]  }
0x1080   :  { %2036 = dma.done.wait [#allocation4], 32  }
0x1081   :  { %2037 = vsyncadd [#allocation4], 4294967264 }
0x1082   :  { %2038 = dma.done.wait [#allocation7], 32  }
0x1083   :  { %2039 = vsyncadd [#allocation7], 4294967264 }
0x1084   :  { %1409 = vsyncpa [#allocation3], 1 }
0x1085   :  { %1410 = vsyncpa [#allocation4], 1 }
0x1086   :  { %1411 = vsyncpa [#allocation7], 1 }

</bundles_post_ra>
